<compile_context>
chip_gen: v7x
topology: tpu7x:2x2x1
jax: 0.10.0
libtpu: 0.0.40
codegen_flags: <defaults>
</compile_context>

<pallas_src>
import functools

import numpy as np
import jax
import jax.numpy as jnp
from jax import lax
from jax.experimental import pallas as pl
from jax.experimental.pallas import tpu as pltpu


# ---------------------------------------------------------------------------
# Chip-dependent knobs
# ---------------------------------------------------------------------------
def _device_kind():
    try:
        return jax.devices()[0].device_kind.lower()
    except Exception:
        return ""


def _vmem_cap_bytes():
    kind = _device_kind()
    # v5e / v6e have 128 MiB physical VMEM -> allow larger tiles; v7x has only
    # 64 MiB, so leave headroom for Mosaic internal scratch / pipeline buffers.
    if any(t in kind for t in ("v4", "v5", "v6")):
        return 100 << 20
    return 56 << 20


def _default_exp_in_bf16():
    # EUP has bf16 exp on v6e/v7x; v5e and older would pay conversions.
    kind = _device_kind()
    return not any(t in kind for t in ("v2", "v3", "v4", "v5"))


def _vmem_limit_bytes(pipelined, scratch=(), extra_bytes=0):
    """VMEM footprint estimate: double-buffered pipelined blocks + scratch
    (once) + in-kernel temporaries, with headroom, clamped per chip."""
    def nbytes(shape, dtype):
        return int(np.prod(shape)) * np.dtype(dtype).itemsize
    total = sum(2 * nbytes(s, d) for s, d in pipelined)
    total += sum(nbytes(s, d) for s, d in scratch)
    total += int(extra_bytes)
    total = int(1.5 * total) + (8 << 20)
    return int(min(max(total, 16 << 20), _vmem_cap_bytes()))


# ---------------------------------------------------------------------------
# Kernel 1: RMSNorm + fused (all-heads) qkv projection + interleaved RoPE
# ---------------------------------------------------------------------------
def _qkv_rope_kernel(x_ref, w_ref, cos_ref, sine_ref, sino_ref,
                     q_ref, kt_ref, v_ref, *, heads, dim_head):
    x = x_ref[0].astype(jnp.float32)                        # (bp, D)
    d_model = x.shape[-1]

    # RMSNorm once per tile: F.normalize(x, dim=-1) * sqrt(D); gamma is folded
    # into the projection weights on the host (exact up to fp rounding).
    ssq = jnp.sum(x * x, axis=-1, keepdims=True)
    xn = x * (float(d_model) ** 0.5 * lax.rsqrt(jnp.maximum(ssq, 1e-24)))

    w = w_ref[...]                                          # (D, 3D), resident
    qkv = jnp.dot(xn.astype(w.dtype), w,
                  preferred_element_type=jnp.float32)       # (bp, 3D) f32

    q = qkv[:, :d_model]
    k = qkv[:, d_model:2 * d_model]
    v = qkv[:, 2 * d_model:]

    cos = cos_ref[...]                                      # (bp, D) f32, per-head tiled
    sin_e = sine_ref[...]                                   # -sin on even lanes, 0 on odd
    sin_o = sino_ref[...]                                   # +sin on odd lanes, 0 on even

    def rope(t):
        # Interleaved rotate_half via two XLU lane rotations over the full,
        # lane-dense D axis; cross-head wrap terms are zero-masked by the sin
        # tables, and the +/- sign of rotate_half is pre-folded into them.
        t_next = pltpu.roll(t, shift=d_model - 1, axis=1)   # t[d+1] at lane d
        t_prev = pltpu.roll(t, shift=1, axis=1)             # t[d-1] at lane d
        return t * cos + t_next * sin_e + t_prev * sin_o

    q_rot = rope(q)                                         # Wq already carries dh**-0.5
    k_rot = rope(k)

    for h in range(heads):                                  # small static loop
        sl = slice(h * dim_head, (h + 1) * dim_head)
        q_ref[0, h] = q_rot[:, sl].astype(q_ref.dtype)      # (bp, dh)
        kt_ref[0, h] = k_rot[:, sl].T.astype(kt_ref.dtype)  # (dh, bp) pre-transposed
        v_ref[0, h] = v[:, sl].astype(v_ref.dtype)          # (bp, dh)


# ---------------------------------------------------------------------------
# Kernel 2: flash attention (online softmax) + fused head-merge/out-projection
# ---------------------------------------------------------------------------
def _flash_attn_out_kernel(q_ref, kt_ref, v_ref, wout_ref, o_ref,
                           m_ref, l_ref, acc_ref, oacc_ref, *, exp_in_bf16):
    h = pl.program_id(2)
    ki = pl.program_id(3)
    num_heads = pl.num_programs(2)
    num_kv = pl.num_programs(3)

    # Zero the fused output accumulator at the start of each (batch, q-tile).
    @pl.when(jnp.logical_and(h == 0, ki == 0))
    def _():
        oacc_ref[...] = jnp.zeros_like(oacc_ref)

    # Reset online-softmax statistics at the start of each head's kv sweep.
    @pl.when(ki == 0)
    def _():
        m_ref[...] = jnp.full_like(m_ref, -jnp.inf)
        l_ref[...] = jnp.zeros_like(l_ref)
        acc_ref[...] = jnp.zeros_like(acc_ref)

    q = q_ref[0, 0]                                         # (bq, dh), pre-scaled
    kt = kt_ref[0, 0]                                       # (dh, bk), K pre-transposed
    v = v_ref[0, 0]                                         # (bk, dh)

    # NOTE: no causal mask — faithful to the PyTorch forward despite the name.
    s = jnp.dot(q, kt, preferred_element_type=jnp.float32)  # (bq, bk) f32

    m_prev = m_ref[...]
    m_new = jnp.maximum(m_prev, jnp.max(s, axis=-1, keepdims=True))
    alpha = jnp.exp(m_prev - m_new)                         # (bq, 1) f32 (tiny)
    shifted = s - m_new
    if exp_in_bf16:                                         # v6e/v7x: bf16 EUP exp
        shifted = shifted.astype(jnp.bfloat16)
    p = jnp.exp(shifted)
    l_ref[...] = alpha * l_ref[...] + jnp.sum(
        p.astype(jnp.float32), axis=-1, keepdims=True)
    acc_ref[...] = alpha * acc_ref[...] + jnp.dot(
        p.astype(v.dtype), v, preferred_element_type=jnp.float32)
    m_ref[...] = m_new

    # End of this head's kv sweep: normalize (exact reciprocal — once per
    # sweep, negligible cost) and fuse this head's (dh -> D) slab of the
    # output projection into the lane-dense accumulator.
    @pl.when(ki == num_kv - 1)
    def _():
        w_o = wout_ref[h]                                   # (dh, D), resident
        head_out = acc_ref[...] * pl.reciprocal(l_ref[...], approx=False)
        oacc_ref[...] += jnp.dot(head_out.astype(w_o.dtype), w_o,
                                 preferred_element_type=jnp.float32)

    # Very last (head, kv) step for this (batch, q-tile): write the output.
    @pl.when(jnp.logical_and(h == num_heads - 1, ki == num_kv - 1))
    def _():
        o_ref[0] = oacc_ref[...].astype(o_ref.dtype)


# ---------------------------------------------------------------------------
# Host-side helpers
# ---------------------------------------------------------------------------
def _rope_tables(seq_len, dim_head, heads):
    """cos / signed-sin tables for interleaved RoPE
    (RotaryEmbedding(dim_head), freqs_for='lang', theta=10000, interp=1.0),
    tiled per head so RoPE runs on the full (n, H*dh) projection in one shot."""
    inv_freq = 1.0 / (10000.0 ** (np.arange(0, dim_head, 2)[: dim_head // 2]
                                  .astype(np.float32) / dim_head))
    t = np.arange(seq_len, dtype=np.float32)
    freqs = np.repeat(np.einsum('n,f->nf', t, inv_freq), 2, axis=-1)  # (N, dh)
    cos = np.cos(freqs).astype(np.float32)
    sin = np.sin(freqs).astype(np.float32)
    even = (np.arange(dim_head) % 2 == 0)
    sin_e = np.where(even, -sin, 0.0).astype(np.float32)   # pairs with roll(+1 fwd)
    sin_o = np.where(~even, sin, 0.0).astype(np.float32)   # pairs with roll(1 back)
    tile = lambda a: np.tile(a, (1, heads))
    return (jnp.asarray(tile(cos)), jnp.asarray(tile(sin_e)),
            jnp.asarray(tile(sin_o)))


def causal_attention(x, gamma, wqkv, wout, *, heads, dim_head,
                     compute_dtype=jnp.bfloat16,
                     block_q=512, block_kv=512, block_proj=512,
                     exp_in_bf16=None):
    """Forward pass of CausalAttention (past_memories=None, eval)."""
    B, N, D = x.shape
    assert D == heads * dim_head
    assert dim_head % 2 == 0

    bq = min(block_q, N)
    bk = min(block_kv, N)
    bp = min(block_proj, N)
    assert N % bq == 0 and N % bk == 0 and N % bp == 0, (N, bq, bk, bp)
    assert bq == N or bq % 8 == 0
    # K is stored transposed (B, H, dh, N): kv / proj tiles land in the lane
    # dim, so they must be lane-dense (multiple of 128) or span the array.
    assert bk == N or bk % 128 == 0, (N, bk)
    assert bp == N or bp % 128 == 0, (N, bp)

    if exp_in_bf16 is None:
        exp_in_bf16 = _default_exp_in_bf16()

    f32 = jnp.float32

    # --- host-side weight prep (free): gamma + dh**-0.5 folded into weights ---
    gamma_col = gamma.astype(f32)[:, None]                  # (D, 1)
    col_scale = jnp.concatenate([
        jnp.full((D,), float(dim_head) ** -0.5, dtype=f32),  # q columns
        jnp.ones((2 * D,), dtype=f32)])                       # k, v columns
    w_fused = (wqkv.astype(f32) * gamma_col * col_scale[None, :]).astype(compute_dtype)
    # Wout as (H, dh, D): merged-head projection == sum_h head_out[h] @ wout_r[h]
    wout_r = wout.astype(f32).reshape(heads, dim_head, D).astype(compute_dtype)

    cos, sin_e, sin_o = _rope_tables(N, dim_head, heads)    # (N, D) each

    # ---------------- kernel 1: rmsnorm + fused qkv + rope ----------------
    qv_struct = jax.ShapeDtypeStruct((B, heads, N, dim_head), compute_dtype)
    kt_struct = jax.ShapeDtypeStruct((B, heads, dim_head, N), compute_dtype)
    vmem1 = _vmem_limit_bytes(
        pipelined=[((1, bp, D), x.dtype),
                   ((D, 3 * D), compute_dtype),             # resident weight
                   ((bp, D), f32), ((bp, D), f32), ((bp, D), f32),
                   ((1, heads, bp, dim_head), compute_dtype),
                   ((1, heads, dim_head, bp), compute_dtype),
                   ((1, heads, bp, dim_head), compute_dtype)],
        extra_bytes=8 * bp * D * 4)                          # in-kernel f32 temps
    q, kt, v = pl.pallas_call(
        functools.partial(_qkv_rope_kernel, heads=heads, dim_head=dim_head),
        out_shape=(qv_struct, kt_struct, qv_struct),
        grid_spec=pltpu.PrefetchScalarGridSpec(
            num_scalar_prefetch=0,
            grid=(B, N // bp),
            in_specs=[
                pl.BlockSpec((1, bp, D), lambda b, t: (b, t, 0)),        # x
                pl.BlockSpec((D, 3 * D), lambda b, t: (0, 0)),           # fused W (resident)
                pl.BlockSpec((bp, D), lambda b, t: (t, 0)),              # cos
                pl.BlockSpec((bp, D), lambda b, t: (t, 0)),              # sin_e
                pl.BlockSpec((bp, D), lambda b, t: (t, 0)),              # sin_o
            ],
            out_specs=[
                pl.BlockSpec((1, heads, bp, dim_head), lambda b, t: (b, 0, t, 0)),
                pl.BlockSpec((1, heads, dim_head, bp), lambda b, t: (b, 0, 0, t)),
                pl.BlockSpec((1, heads, bp, dim_head), lambda b, t: (b, 0, t, 0)),
            ],
        ),
        compiler_params=pltpu.CompilerParams(
            dimension_semantics=("parallel", "parallel"),
            vmem_limit_bytes=vmem1),
    )(x, w_fused, cos, sin_e, sin_o)

    # ------------ kernel 2: flash attention + fused out-projection ----------
    vmem2 = _vmem_limit_bytes(
        pipelined=[((1, 1, bq, dim_head), compute_dtype),
                   ((1, 1, dim_head, bk), compute_dtype),
                   ((1, 1, bk, dim_head), compute_dtype),
                   ((heads, dim_head, D), compute_dtype),    # resident Wout
                   ((1, bq, D), x.dtype)],
        scratch=[((bq, 1), f32), ((bq, 1), f32),
                 ((bq, dim_head), f32), ((bq, D), f32)],
        extra_bytes=4 * bq * bk * 4)                         # s / p temporaries
    out = pl.pallas_call(
        functools.partial(_flash_attn_out_kernel, exp_in_bf16=bool(exp_in_bf16)),
        out_shape=jax.ShapeDtypeStruct((B, N, D), x.dtype),
        grid_spec=pltpu.PrefetchScalarGridSpec(
            num_scalar_prefetch=0,
            grid=(B, N // bq, heads, N // bk),
            in_specs=[
                pl.BlockSpec((1, 1, bq, dim_head),
                             lambda b, qi, h, ki: (b, h, qi, 0)),        # q
                pl.BlockSpec((1, 1, dim_head, bk),
                             lambda b, qi, h, ki: (b, h, 0, ki)),        # k^T
                pl.BlockSpec((1, 1, bk, dim_head),
                             lambda b, qi, h, ki: (b, h, ki, 0)),        # v
                pl.BlockSpec((heads, dim_head, D),
                             lambda b, qi, h, ki: (0, 0, 0)),            # Wout (resident)
            ],
            out_specs=pl.BlockSpec((1, bq, D), lambda b, qi, h, ki: (b, qi, 0)),
            scratch_shapes=[
                pltpu.VMEM((bq, 1), f32),          # running max m
                pltpu.VMEM((bq, 1), f32),          # running sum l
                pltpu.VMEM((bq, dim_head), f32),   # per-head un-normalized acc
                pltpu.VMEM((bq, D), f32),          # fused out-projection acc
            ],
        ),
        compiler_params=pltpu.CompilerParams(
            dimension_semantics=("parallel", "parallel", "arbitrary", "arbitrary"),
            vmem_limit_bytes=vmem2),
    )(q, kt, v, wout_r)
    return out


# ---------------------------------------------------------------------------
# Plain-JAX mirror of the PyTorch forward (f32, for verification)
# ---------------------------------------------------------------------------
def causal_attention_reference(x, gamma, wqkv, wout, *, heads, dim_head):
    B, N, D = x.shape
    l2 = jnp.sqrt(jnp.sum(x * x, axis=-1, keepdims=True))
    xn = x / jnp.maximum(l2, 1e-12) * (float(D) ** 0.5) * gamma
    qkv = xn @ wqkv
    q, k, v = jnp.split(qkv, 3, axis=-1)

    def split_heads(t):
        return t.reshape(B, N, heads, dim_head).transpose(0, 2, 1, 3)
    q, k, v = map(split_heads, (q, k, v))

    inv_freq = 1.0 / (10000.0 ** (np.arange(0, dim_head, 2)[: dim_head // 2]
                                  .astype(np.float32) / dim_head))
    t = np.arange(N, dtype=np.float32)
    freqs = np.repeat(np.einsum('n,f->nf', t, inv_freq), 2, axis=-1)
    cos = jnp.asarray(np.cos(freqs), jnp.float32)
    sin = jnp.asarray(np.sin(freqs), jnp.float32)

    def rot_half(t):
        t2 = t.reshape(*t.shape[:-1], dim_head // 2, 2)
        a, bb = t2[..., 0], t2[..., 1]
        return jnp.stack([-bb, a], axis=-1).reshape(t.shape)

    q = q * cos + rot_half(q) * sin
    k = k * cos + rot_half(k) * sin
    sim = jnp.einsum('bhid,bhjd->bhij', q, k) * (float(dim_head) ** -0.5)
    attn = jax.nn.softmax(sim, axis=-1)
    out = jnp.einsum('bhij,bhjd->bhid', attn, v)
    out = out.transpose(0, 2, 1, 3).reshape(B, N, D)
    return out @ wout


if __name__ == "__main__":
    # Small shapes consistent with the module (dim = heads * dim_head).
    # N=256 with 128-wide tiles exercises the multi-tile projection, the
    # multi-step online softmax and the multi-head output accumulation paths
    # while keeping the kv/proj tiles lane-dense for the transposed-K layout.
    B, N, heads, dim_head = 2, 256, 2, 64
    D = heads * dim_head  # 128

    key = jax.random.PRNGKey(0)
    kx, kg, kq, ko = jax.random.split(key, 4)
    x = jax.random.normal(kx, (B, N, D), dtype=jnp.float32)
    gamma = 1.0 + 0.1 * jax.random.normal(kg, (D,), dtype=jnp.float32)
    wqkv = jax.random.normal(kq, (D, 3 * D), dtype=jnp.float32) / np.sqrt(D)
    wout = jax.random.normal(ko, (D, D), dtype=jnp.float32) / np.sqrt(D)

    ref = jax.block_until_ready(
        causal_attention_reference(x, gamma, wqkv, wout,
                                   heads=heads, dim_head=dim_head))

    # f32 MXU path with f32 softmax exponentials.
    out_f32 = jax.block_until_ready(causal_attention(
        x, gamma, wqkv, wout, heads=heads, dim_head=dim_head,
        compute_dtype=jnp.float32, exp_in_bf16=False,
        block_q=128, block_kv=128, block_proj=128))
    np.testing.assert_allclose(np.asarray(out_f32), np.asarray(ref),
                               rtol=2e-2, atol=2e-2)

    # bf16 MXU path (recommended on v6e/v7x) — f32 accumulation, softmax exp
    # dtype auto-selected from the chip generation.
    out_bf16 = jax.block_until_ready(causal_attention(
        x, gamma, wqkv, wout, heads=heads, dim_head=dim_head,
        compute_dtype=jnp.bfloat16,
        block_q=128, block_kv=128, block_proj=128))
    np.testing.assert_allclose(np.asarray(out_bf16), np.asarray(ref),
                               rtol=8e-2, atol=8e-2)

    print("KERNEL_OK")
</pallas_src>

<mosaic_0001>
module attributes {stable_mosaic.version = 11 : i64} {
  func.func @_qkv_rope_kernel(%arg0: i32, %arg1: i32, %arg2: memref<1x128x128xf32, #tpu.memory_space<vmem>>, %arg3: memref<128x384xf32, #tpu.memory_space<vmem>>, %arg4: memref<128x128xf32, #tpu.memory_space<vmem>>, %arg5: memref<128x128xf32, #tpu.memory_space<vmem>>, %arg6: memref<128x128xf32, #tpu.memory_space<vmem>>, %arg7: memref<1x2x128x64xf32, #tpu.memory_space<vmem>>, %arg8: memref<1x2x64x128xf32, #tpu.memory_space<vmem>>, %arg9: memref<1x2x128x64xf32, #tpu.memory_space<vmem>>) attributes {dimension_semantics = [#tpu.dimension_semantics<parallel>, #tpu.dimension_semantics<parallel>], iteration_bounds = array<i64: 2, 2>, scalar_prefetch = 0 : i64, scratch_operands = 0 : i64, tpu.core_type = #tpu.core_type<tc>, window_params = [{transform_indices = @transform_0, window_bounds = array<i64: 1, 128, 128>}, {pipeline_mode = #tpu.pipeline_mode<synchronous>, transform_indices = @transform_1, window_bounds = array<i64: 128, 384>}, {transform_indices = @transform_2, window_bounds = array<i64: 128, 128>}, {transform_indices = @transform_3, window_bounds = array<i64: 128, 128>}, {transform_indices = @transform_4, window_bounds = array<i64: 128, 128>}, {transform_indices = @transform_5, window_bounds = array<i64: 1, 2, 128, 64>}, {transform_indices = @transform_6, window_bounds = array<i64: 1, 2, 64, 128>}, {transform_indices = @transform_7, window_bounds = array<i64: 1, 2, 128, 64>}]} {
    %c0 = arith.constant 0 : index
    %c0_0 = arith.constant 0 : index
    %c0_1 = arith.constant 0 : index
    %0 = vector.load %arg2[%c0, %c0_0, %c0_1] : memref<1x128x128xf32, #tpu.memory_space<vmem>>, vector<1x128x128xf32>
    %1 = vector.shape_cast %0 : vector<1x128x128xf32> to vector<128x128xf32>
    %2 = arith.mulf %1, %1 : vector<128x128xf32>
    %cst = arith.constant dense<0.000000e+00> : vector<128xf32>
    %3 = vector.multi_reduction <add>, %2, %cst [1] : vector<128x128xf32> to vector<128xf32>
    %4 = vector.shape_cast %3 : vector<128xf32> to vector<128x1xf32>
    %cst_2 = arith.constant 1.000000e-24 : f32
    %5 = vector.broadcast %cst_2 : f32 to vector<128x1xf32>
    %6 = arith.maximumf %4, %5 : vector<128x1xf32>
    %7 = math.rsqrt %6 : vector<128x1xf32>
    %cst_3 = arith.constant 11.3137083 : f32
    %8 = vector.broadcast %cst_3 : f32 to vector<128x1xf32>
    %9 = arith.mulf %8, %7 : vector<128x1xf32>
    %10 = vector.broadcast %9 : vector<128x1xf32> to vector<128x128xf32>
    %11 = arith.mulf %1, %10 : vector<128x128xf32>
    %c0_4 = arith.constant 0 : index
    %c0_5 = arith.constant 0 : index
    %12 = vector.load %arg3[%c0_4, %c0_5] : memref<128x384xf32, #tpu.memory_space<vmem>>, vector<128x384xf32>
    %cst_6 = arith.constant dense<0.000000e+00> : vector<128x384xf32>
    %13 = tpu.matmul %11, %12, %cst_6 {dimension_numbers = #tpu.dot_dimension_numbers<[1], [0], [0], [1], [0, 0, 1, 1], [], []>} : vector<128x128xf32>, vector<128x384xf32>, vector<128x384xf32> -> vector<128x384xf32>
    %14 = vector.extract_strided_slice %13 {offsets = [0, 0], sizes = [128, 128], strides = [1, 1]} : vector<128x384xf32> to vector<128x128xf32>
    %15 = vector.extract_strided_slice %13 {offsets = [0, 128], sizes = [128, 128], strides = [1, 1]} : vector<128x384xf32> to vector<128x128xf32>
    %16 = vector.extract_strided_slice %13 {offsets = [0, 256], sizes = [128, 128], strides = [1, 1]} : vector<128x384xf32> to vector<128x128xf32>
    %c0_7 = arith.constant 0 : index
    %c0_8 = arith.constant 0 : index
    %17 = vector.load %arg4[%c0_7, %c0_8] : memref<128x128xf32, #tpu.memory_space<vmem>>, vector<128x128xf32>
    %c0_9 = arith.constant 0 : index
    %c0_10 = arith.constant 0 : index
    %18 = vector.load %arg5[%c0_9, %c0_10] : memref<128x128xf32, #tpu.memory_space<vmem>>, vector<128x128xf32>
    %c0_11 = arith.constant 0 : index
    %c0_12 = arith.constant 0 : index
    %19 = vector.load %arg6[%c0_11, %c0_12] : memref<128x128xf32, #tpu.memory_space<vmem>>, vector<128x128xf32>
    %c127_i32 = arith.constant 127 : i32
    %20 = tpu.dynamic_rotate %14 by %c127_i32 dim 1 : vector<128x128xf32>, i32 -> vector<128x128xf32>
    %c1_i32 = arith.constant 1 : i32
    %21 = tpu.dynamic_rotate %14 by %c1_i32 dim 1 : vector<128x128xf32>, i32 -> vector<128x128xf32>
    %22 = arith.mulf %14, %17 : vector<128x128xf32>
    %23 = arith.mulf %20, %18 : vector<128x128xf32>
    %24 = arith.addf %22, %23 : vector<128x128xf32>
    %25 = arith.mulf %21, %19 : vector<128x128xf32>
    %26 = arith.addf %24, %25 : vector<128x128xf32>
    %c127_i32_13 = arith.constant 127 : i32
    %27 = tpu.dynamic_rotate %15 by %c127_i32_13 dim 1 : vector<128x128xf32>, i32 -> vector<128x128xf32>
    %c1_i32_14 = arith.constant 1 : i32
    %28 = tpu.dynamic_rotate %15 by %c1_i32_14 dim 1 : vector<128x128xf32>, i32 -> vector<128x128xf32>
    %29 = arith.mulf %15, %17 : vector<128x128xf32>
    %30 = arith.mulf %27, %18 : vector<128x128xf32>
    %31 = arith.addf %29, %30 : vector<128x128xf32>
    %32 = arith.mulf %28, %19 : vector<128x128xf32>
    %33 = arith.addf %31, %32 : vector<128x128xf32>
    %34 = vector.extract_strided_slice %26 {offsets = [0, 0], sizes = [128, 64], strides = [1, 1]} : vector<128x128xf32> to vector<128x64xf32>
    %c0_15 = arith.constant 0 : index
    %c0_16 = arith.constant 0 : index
    %c0_17 = arith.constant 0 : index
    %c0_18 = arith.constant 0 : index
    %35 = vector.load %arg7[%c0_15, %c0_16, %c0_17, %c0_18] : memref<1x2x128x64xf32, #tpu.memory_space<vmem>>, vector<1x1x128x64xf32>
    %36 = vector.shape_cast %35 : vector<1x1x128x64xf32> to vector<128x64xf32>
    %37 = vector.shape_cast %34 : vector<128x64xf32> to vector<1x1x128x64xf32>
    tpu.vector_store %arg7[%c0_15, %c0_16, %c0_17, %c0_18], %37 {strides = array<i32>} : memref<1x2x128x64xf32, #tpu.memory_space<vmem>>, vector<1x1x128x64xf32>,
    %38 = vector.extract_strided_slice %33 {offsets = [0, 0], sizes = [128, 64], strides = [1, 1]} : vector<128x128xf32> to vector<128x64xf32>
    %39 = tpu.transpose %38, [1, 0] : vector<128x64xf32> -> vector<64x128xf32>
    %c0_19 = arith.constant 0 : index
    %c0_20 = arith.constant 0 : index
    %c0_21 = arith.constant 0 : index
    %c0_22 = arith.constant 0 : index
    %40 = vector.load %arg8[%c0_19, %c0_20, %c0_21, %c0_22] : memref<1x2x64x128xf32, #tpu.memory_space<vmem>>, vector<1x1x64x128xf32>
    %41 = vector.shape_cast %40 : vector<1x1x64x128xf32> to vector<64x128xf32>
    %42 = vector.shape_cast %39 : vector<64x128xf32> to vector<1x1x64x128xf32>
    tpu.vector_store %arg8[%c0_19, %c0_20, %c0_21, %c0_22], %42 {strides = array<i32>} : memref<1x2x64x128xf32, #tpu.memory_space<vmem>>, vector<1x1x64x128xf32>,
    %43 = vector.extract_strided_slice %16 {offsets = [0, 0], sizes = [128, 64], strides = [1, 1]} : vector<128x128xf32> to vector<128x64xf32>
    %c0_23 = arith.constant 0 : index
    %c0_24 = arith.constant 0 : index
    %c0_25 = arith.constant 0 : index
    %c0_26 = arith.constant 0 : index
    %44 = vector.load %arg9[%c0_23, %c0_24, %c0_25, %c0_26] : memref<1x2x128x64xf32, #tpu.memory_space<vmem>>, vector<1x1x128x64xf32>
    %45 = vector.shape_cast %44 : vector<1x1x128x64xf32> to vector<128x64xf32>
    %46 = vector.shape_cast %43 : vector<128x64xf32> to vector<1x1x128x64xf32>
    tpu.vector_store %arg9[%c0_23, %c0_24, %c0_25, %c0_26], %46 {strides = array<i32>} : memref<1x2x128x64xf32, #tpu.memory_space<vmem>>, vector<1x1x128x64xf32>,
    %47 = vector.extract_strided_slice %26 {offsets = [0, 64], sizes = [128, 64], strides = [1, 1]} : vector<128x128xf32> to vector<128x64xf32>
    %c0_27 = arith.constant 0 : index
    %c1 = arith.constant 1 : index
    %c0_28 = arith.constant 0 : index
    %c0_29 = arith.constant 0 : index
    %48 = vector.load %arg7[%c0_27, %c1, %c0_28, %c0_29] : memref<1x2x128x64xf32, #tpu.memory_space<vmem>>, vector<1x1x128x64xf32>
    %49 = vector.shape_cast %48 : vector<1x1x128x64xf32> to vector<128x64xf32>
    %50 = vector.shape_cast %47 : vector<128x64xf32> to vector<1x1x128x64xf32>
    tpu.vector_store %arg7[%c0_27, %c1, %c0_28, %c0_29], %50 {strides = array<i32>} : memref<1x2x128x64xf32, #tpu.memory_space<vmem>>, vector<1x1x128x64xf32>,
    %51 = vector.extract_strided_slice %33 {offsets = [0, 64], sizes = [128, 64], strides = [1, 1]} : vector<128x128xf32> to vector<128x64xf32>
    %52 = tpu.transpose %51, [1, 0] : vector<128x64xf32> -> vector<64x128xf32>
    %c0_30 = arith.constant 0 : index
    %c1_31 = arith.constant 1 : index
    %c0_32 = arith.constant 0 : index
    %c0_33 = arith.constant 0 : index
    %53 = vector.load %arg8[%c0_30, %c1_31, %c0_32, %c0_33] : memref<1x2x64x128xf32, #tpu.memory_space<vmem>>, vector<1x1x64x128xf32>
    %54 = vector.shape_cast %53 : vector<1x1x64x128xf32> to vector<64x128xf32>
    %55 = vector.shape_cast %52 : vector<64x128xf32> to vector<1x1x64x128xf32>
    tpu.vector_store %arg8[%c0_30, %c1_31, %c0_32, %c0_33], %55 {strides = array<i32>} : memref<1x2x64x128xf32, #tpu.memory_space<vmem>>, vector<1x1x64x128xf32>,
    %56 = vector.extract_strided_slice %16 {offsets = [0, 64], sizes = [128, 64], strides = [1, 1]} : vector<128x128xf32> to vector<128x64xf32>
    %c0_34 = arith.constant 0 : index
    %c1_35 = arith.constant 1 : index
    %c0_36 = arith.constant 0 : index
    %c0_37 = arith.constant 0 : index
    %57 = vector.load %arg9[%c0_34, %c1_35, %c0_36, %c0_37] : memref<1x2x128x64xf32, #tpu.memory_space<vmem>>, vector<1x1x128x64xf32>
    %58 = vector.shape_cast %57 : vector<1x1x128x64xf32> to vector<128x64xf32>
    %59 = vector.shape_cast %56 : vector<128x64xf32> to vector<1x1x128x64xf32>
    tpu.vector_store %arg9[%c0_34, %c1_35, %c0_36, %c0_37], %59 {strides = array<i32>} : memref<1x2x128x64xf32, #tpu.memory_space<vmem>>, vector<1x1x128x64xf32>,
    return
  }
  func.func @transform_0(%arg0: i32, %arg1: i32) -> (i32, i32, i32) {
    %c0_i32 = arith.constant 0 : i32
    %c0_i32_0 = arith.constant 0 : i32
    return %arg0, %arg1, %c0_i32 : i32, i32, i32
  }
  func.func @transform_1(%arg0: i32, %arg1: i32) -> (i32, i32) {
    %c0_i32 = arith.constant 0 : i32
    %c0_i32_0 = arith.constant 0 : i32
    %c0_i32_1 = arith.constant 0 : i32
    return %c0_i32, %c0_i32_0 : i32, i32
  }
  func.func @transform_2(%arg0: i32, %arg1: i32) -> (i32, i32) {
    %c0_i32 = arith.constant 0 : i32
    %c0_i32_0 = arith.constant 0 : i32
    return %arg1, %c0_i32 : i32, i32
  }
  func.func @transform_3(%arg0: i32, %arg1: i32) -> (i32, i32) {
    %c0_i32 = arith.constant 0 : i32
    %c0_i32_0 = arith.constant 0 : i32
    return %arg1, %c0_i32 : i32, i32
  }
  func.func @transform_4(%arg0: i32, %arg1: i32) -> (i32, i32) {
    %c0_i32 = arith.constant 0 : i32
    %c0_i32_0 = arith.constant 0 : i32
    return %arg1, %c0_i32 : i32, i32
  }
  func.func @transform_5(%arg0: i32, %arg1: i32) -> (i32, i32, i32, i32) {
    %c0_i32 = arith.constant 0 : i32
    %c0_i32_0 = arith.constant 0 : i32
    %c0_i32_1 = arith.constant 0 : i32
    return %arg0, %c0_i32, %arg1, %c0_i32_0 : i32, i32, i32, i32
  }
  func.func @transform_6(%arg0: i32, %arg1: i32) -> (i32, i32, i32, i32) {
    %c0_i32 = arith.constant 0 : i32
    %c0_i32_0 = arith.constant 0 : i32
    %c0_i32_1 = arith.constant 0 : i32
    return %arg0, %c0_i32, %c0_i32_0, %arg1 : i32, i32, i32, i32
  }
  func.func @transform_7(%arg0: i32, %arg1: i32) -> (i32, i32, i32, i32) {
    %c0_i32 = arith.constant 0 : i32
    %c0_i32_0 = arith.constant 0 : i32
    %c0_i32_1 = arith.constant 0 : i32
    return %arg0, %c0_i32, %arg1, %c0_i32_0 : i32, i32, i32, i32
  }
}

</mosaic_0001>

<bundles_post_ra>
// kernel: tpu_custom_call.1
= control target key start
LH: loop header
LB: loop body
LE: loop exit
PB: predicated region body
PF: predicated region fallthrough
CT: control target
= control target key end

     0   :  { %s4295_s0 = inlined_call_operand.hbm [shape: f32[2,256,128], index: 0, kind: input, shape index: {}]   ;;  %s4296_s1 = inlined_call_operand.hbm [shape: f32[128,384], index: 1, kind: input, shape index: {}]   ;;  %s4297_s2 = inlined_call_operand.hbm [shape: f32[256,128], index: 2, kind: input, shape index: {}]   ;;  %s4298_s3 = inlined_call_operand.hbm [shape: f32[256,128], index: 3, kind: input, shape index: {}]   ;;  %s4299_s4 = inlined_call_operand.hbm [shape: f32[256,128], index: 4, kind: input, shape index: {}]   ;;  %s4300_s5 = inlined_call_operand.vmem [shape: f32[2,2,256,64], index: 5, kind: output, shape index: {0}]   ;;  %s4301_s6 = inlined_call_operand.hbm [shape: f32[2,2,64,256], index: 6, kind: output, shape index: {1}]   ;;  %s4302_s7 = inlined_call_operand.vmem [shape: f32[2,2,256,64], index: 7, kind: output, shape index: {2}]  }
   0x1   :  { %4324 = sst [smem:[#allocation26_spill]] %s4295_s0 }
   0x2   :  { %4325 = sst [smem:[#allocation27_spill]] %s4296_s1 }
   0x3   :  { %4326 = sst [smem:[#allocation28_spill]] %s4297_s2 }
   0x4   :  { %4327 = sst [smem:[#allocation29_spill]] %s4298_s3 }
   0x5   :  { %4328 = sst [smem:[#allocation30_spill]] %s4299_s4 }
   0x6   :  { %4329 = sst [smem:[#allocation31_spill]] %s4300_s5 }
   0x7   :  { %4330 = sst [smem:[#allocation32_spill]] %s4301_s6 }
   0x8   :  { %4331 = sst [smem:[#allocation33_spill]] %s4302_s7 }
   0x9   :  { %13 = vsyncpa [#allocation3], 0 }
   0xa   :  { %15 = vsyncpa [#allocation3 + $0x1], 0 }
   0xb   :  { %16 = vsyncpa [#allocation6], 0 }
   0xc   :  { %17 = vsyncpa [#allocation4], 0 }
   0xd   :  { %19 = vsyncpa [#allocation4 + $0x1], 0  ;;  %s2937_s24 = smov 0   ;;  %s2939_s25 = smov 0  }
   0xe   :  { %s2941_s26 = smov 0   ;;  %s2943_s27 = smov 0  }
   0xf   :  { %s2945_s28 = smov 0   ;;  %s2947_s29 = smov 0  }
  0x10   :  { %s2949_s30 = smov 0   ;;  %s2951_s8 = smov 0  }
  0x11   :  { %s2953_s9 = smov 0   ;;  %s2955_s10 = smov 0  }
  0x12   :  { %s2957_s11 = smov 0  }
  0x13 LB: > { %4332 = sst [smem:[#allocation17_spill]] %s2858_s29  ;;  %s34_s12 = sadd.s32 1, %s2870_s9  ;;  %s2878_s11 = sphi %s2957_s11, %s25_s11   ;;  %s2874_s10 = sphi %s2955_s10, %s4388_s10   ;;  %s2870_s9 = sphi %s2953_s9, %s4387_s9   ;;  %s2866_s8 = sphi %s2951_s8, %s4386_s8   ;;  %s2862_s30 = sphi %s2949_s30, %s4385_s30   ;;  %s2858_s29 = sphi %s2947_s29, %s4384_s29   ;;  %s2854_s28 = sphi %s2945_s28, %s4393_s28   ;;  %s2850_s27 = sphi %s2943_s27, %s4392_s27   ;;  %s2846_s26 = sphi %s2941_s26, %s4391_s26   ;;  %s2842_s25 = sphi %s2939_s25, %s4390_s25   ;;  %s2838_s24 = sphi %s2937_s24, %s4389_s24  }
  0x14   : > { %4333 = sst [smem:[#allocation18_spill]] %s2862_s30  ;;  %s37_s13 = sadd.s32 1, %s2874_s10 }
  0x15   : > { %4334 = sst [smem:[#allocation19_spill]] %s2866_s8  ;;  %p35_p0 = scmp.ge.s32.totalorder %s34_s12, 2 }
  0x16   : > { %4335 = sst [smem:[#allocation20_spill]] %s2870_s9  ;;  %s46_s14 = sadd.s32 1, %s2858_s29 }
  0x17   : > { %4336 = sst [smem:[#allocation21_spill]] %s2874_s10  ;;  %p4307_p1 = scmp.ne.s32.totalorder %s2858_s29, %s2854_s28 }
  0x18   : > { %p4309_p2 = scmp.eq.s32.totalorder %s2878_s11, 0  ;;  %s4395_s12 = smov (%p35_p0, %s34_s12), 0 }
  0x19   : > { %4337 = sst [smem:[#allocation22_spill]] %s4395_s12  ;;  %s4397_s13 = smov (!%p35_p0, %s37_s13), %s2874_s10 }
  0x1a   : > { %s3003_s15 = ssub.s32 %s2870_s9, %s4395_s12  ;;  %p3010_p3 = por %p4309_p2, %p4307_p1 }
  0x1b   : > { %p39_p4 = scmp.ge.s32.totalorder %s4397_s13, 2  ;;  %p91_p5 = scmp.eq.s32.totalorder %s3003_s15, 0 }
  0x1c   : > { %p4308_p6 = scmp.lt.s32.totalorder %s2878_s11, 4  ;;  %s279_s17 = sand.u32 1, %s2878_s11  }
  0x1d   : > { %s4399_s13 = smov (%p39_p4, %s4397_s13), 0  ;;  %s281_s18 = sand.u32 1, %s2858_s29  }
  0x1e   : > { %4339 = sst [smem:[#allocation23_spill]] %s4399_s13  ;;  %s41_s19 = ssub.s32 %s2874_s10, %s4399_s13 }
  0x1f   : > { %s43_s20 = sor.u32 %s3003_s15, %s41_s19  ;;  %s2199_s21 = sshll.u32 %s281_s18, 7 }
  0x20   : > { %p44_p7 = scmp.eq.s32.totalorder %s43_s20, 0  ;;  %s2200_s22 = sshll.u32 %s2870_s9, 4 }
  0x21   : > { %s2201_s23 = sshll.u32 %s2874_s10, 5  ;;  %s283_s6 = scalar_lea.vmem [#allocation2], %s2199_s21 }
  0x22   : > { %s3026_s12 = scalar_select %p44_p7, %s2858_s29, %s46_s14  }
  0x23   : > { %s289_s7 = sadd.s32 %s2201_s23, %s2200_s22  ;;  %s292_s5 = sshll.u32 %s283_s6, 4  ;;  %s3028_s5 = int_to_ptr.vmem [resolvable:$true] %s292_s5 }
  0x24   : > { %4340 = sst [smem:[#allocation24_spill]] %s3026_s12  ;;  %s2202_s8 = sshll.u32 %s289_s7, 7 }
  0x25   : > { %s4341_s0 = sld [smem:[#allocation26_spill]]  ;;  %p3039_p8 = pnand %p4308_p6, %p3010_p3 }
  0x26   : > { %s3043_s6 = scalar_lea.sflag [#allocation3], %s279_s17 }
  0x27   : > { %p2602_p10 = pneg %p3039_p8 }
  0x2b   : > { %s3033_s4 = scalar_lea.hbm %s4341_s0, %s2202_s8  ;;  %s2605_s8 = scalar_lea.hbm %s4341_s0, 8192 }
  0x2c   : > { %s2600_s7 = scalar_lea.hbm %s3033_s4, 2048  ;;  %p2606_p13 = scmp.lt.u32.totalorder %s3033_s4, %s4341_s0 }
  0x2d   : > { %p2601_p9 = scmp.ne.s32.totalorder %s3033_s4, %s2600_s7  ;;  %p2607_p0 = scmp.lt.u32.totalorder %s2605_s8, %s2600_s7 }
  0x2e   : > { %p2609_p4 = scmp.lt.u32.totalorder %s2600_s7, %s3033_s4 }
  0x2f   : > { %p2603_p11 = pnand %p2602_p10, %p2601_p9  ;;  %p2608_p3 = por %p2607_p0, %p2606_p13 }
  0x31   : > { %p2604_p12 = pneg %p2603_p11  ;;  %p2610_p7 = por %p2609_p4, %p2608_p3 }
  0x33   : > { %p2611_p1 = pnand %p2610_p7, %p2604_p12 }
  0x35   : > { %2614 = shalt.err (!%p2611_p1)
}
  0x36   : > { %s2615_s17 = scalar_lea.vmem %s3028_s5, 2048  ;;  %s2880_s19 = smov [#allocation2]  }
  0x37   : > { %p2616_p9 = scmp.ne.s32.totalorder %s3028_s5, %s2615_s17  ;;  %s2620_s20 = sshll.u32 %s2880_s19, 4  ;;  %s2621_s20 = int_to_ptr.vmem [resolvable:$false] %s2620_s20 }
  0x38   : > { %s2622_s21 = scalar_lea.vmem %s2621_s20, 4096  ;;  %p2623_p2 = scmp.lt.s32.totalorder %s3028_s5, %s2621_s20 }
  0x39   : > { %p2618_p11 = pnand %p2616_p9, %p2602_p10  ;;  %p2624_p13 = scmp.lt.s32.totalorder %s2622_s21, %s2615_s17 }
  0x3b   : > { %p2619_p6 = pneg %p2618_p11  ;;  %p2625_p0 = por %p2624_p13, %p2623_p2 }
  0x3d   : > { %p2626_p3 = pnand %p2625_p0, %p2619_p6 }
  0x3f   : > { %2629 = shalt.err (!%p2626_p3)
}
  0x40   : > { %s4311_s22 = smov 128   ;;  %s4312_s23 = smov 8  }
  0x41   : > { %2450 = dma.hbm_to_vmem [thread:$0]  (!%p3039_p8), %s3033_s4, 2048, %s3028_s5, %s3043_s6, %s4311_s22, %s4311_s22, %s4312_s23  }
  0x42   : > { %s3075_s7 = sshll.u32 %s2870_s9, 11  ;;  %s93_s1 = sadd.s32 1, %s2846_s26 }
  0x43   : > { %p100_p1 = scmp.ne.s32.totalorder %s2846_s26, %s2842_s25  ;;  %p4344_p2 = scmp.eq.s32.totalorder %s2878_s11, 0 }
  0x44   : > { %s3083_s30 = scalar_select %p91_p5, %s2846_s26, %s93_s1  }
  0x45   : > { %p102_p6 = por %p100_p1, %p4344_p2  ;;  %s304_s8 = sand.u32 1, %s2846_s26  }
  0x46   : > { %4343 = sst [smem:[#allocation25_spill]] %s3083_s30  ;;  %s3088_s16 = sshll.u32 %s304_s8, 7 }
  0x47   : > { %s4345_s2 = sld [smem:[#allocation28_spill]]  ;;  %p4346_p8 = scmp.lt.s32.totalorder %s2878_s11, 4 }
  0x48   : > { %s306_s5 = scalar_lea.vmem [#allocation7], %s3088_s16 }
  0x49   : > { %p3098_p10 = pnand %p4346_p8, %p102_p6  ;;  %s313_s15 = sshll.u32 %s306_s5, 4  ;;  %s3103_s15 = int_to_ptr.vmem [resolvable:$true] %s313_s15 }
  0x4b   : > { %s4347_s4 = scalar_select %p3098_p10, 1, 0 }
  0x4c   : > { %p3109_p12 = pneg %p3098_p10 }
  0x4d   : > { %s3094_s14 = scalar_lea.hbm %s4345_s2, %s3075_s7  ;;  %s2635_s8 = scalar_lea.hbm %s4345_s2, 4096 }
  0x4e   : > { %s2630_s19 = scalar_lea.hbm %s3094_s14, 2048  ;;  %p2636_p9 = scmp.lt.u32.totalorder %s3094_s14, %s4345_s2 }
  0x4f   : > { %p2631_p5 = scmp.ne.s32.totalorder %s3094_s14, %s2630_s19  ;;  %p2637_p11 = scmp.lt.u32.totalorder %s2635_s8, %s2630_s19 }
  0x50   : > { %s4348_s20 = scalar_select %p3109_p12, 1, 0 }
  0x51   : > { %p2633_p4 = pnand %p3109_p12, %p2631_p5  ;;  %p2638_p13 = por %p2637_p11, %p2636_p9 }
  0x52   : > { %p2639_p0 = scmp.lt.u32.totalorder %s2630_s19, %s3094_s14 }
  0x53   : > { %p2634_p7 = pneg %p2633_p4 }
  0x54   : > { %p2640_p3 = por %p2639_p0, %p2638_p13 }
  0x56   : > { %p2641_p1 = pnand %p2640_p3, %p2634_p7 }
  0x58   : > { %2644 = shalt.err (!%p2641_p1)
}
  0x59   : > { %s2645_s5 = scalar_lea.vmem %s3103_s15, 2048  ;;  %s2883_s21 = smov [#allocation7]  }
  0x5a   : > { %p2646_p2 = scmp.ne.s32.totalorder %s3103_s15, %s2645_s5  ;;  %s2650_s1 = sshll.u32 %s2883_s21, 4  ;;  %s2651_s1 = int_to_ptr.vmem [resolvable:$false] %s2650_s1 }
  0x5b   : > { %s2652_s18 = scalar_lea.vmem %s2651_s1, 4096  ;;  %p2653_p5 = scmp.lt.s32.totalorder %s3103_s15, %s2651_s1 }
  0x5c   : > { %p2648_p6 = pnand %p2646_p2, %p3109_p12  ;;  %p2654_p4 = scmp.lt.s32.totalorder %s2652_s18, %s2645_s5 }
  0x5e   : > { %p2649_p8 = pneg %p2648_p6  ;;  %p2655_p9 = por %p2654_p4, %p2653_p5 }
  0x60   : > { %p2656_p11 = pnand %p2655_p9, %p2649_p8 }
  0x62   : > { %2659 = shalt.err (!%p2656_p11)
}
  0x63   : > { %2453 = dma.hbm_to_vmem [thread:$0]  (!%p3098_p10), %s3094_s14, 2048, %s3103_s15, %s3043_s6, %s4311_s22, %s4311_s22, %s4312_s23  }
  0x64   : > { %s4349_s3 = sld [smem:[#allocation29_spill]]  ;;  %s327_s5 = scalar_lea.vmem [#allocation8], %s3088_s16 }
  0x65   : > { %s334_s21 = sshll.u32 %s327_s5, 4  ;;  %s3143_s21 = int_to_ptr.vmem [resolvable:$true] %s334_s21 }
  0x6a   : > { %s3140_s17 = scalar_lea.hbm %s4349_s3, %s3075_s7  ;;  %s2665_s15 = scalar_lea.hbm %s4349_s3, 4096 }
  0x6b   : > { %s2660_s1 = scalar_lea.hbm %s3140_s17, 2048  ;;  %p2666_p3 = scmp.lt.u32.totalorder %s3140_s17, %s4349_s3 }
  0x6c   : > { %p2661_p7 = scmp.ne.s32.totalorder %s3140_s17, %s2660_s1  ;;  %p2667_p1 = scmp.lt.u32.totalorder %s2665_s15, %s2660_s1 }
  0x6d   : > { %p2669_p6 = scmp.lt.u32.totalorder %s2660_s1, %s3140_s17 }
  0x6e   : > { %p2663_p13 = pnand %p2661_p7, %p3109_p12  ;;  %p2668_p2 = por %p2667_p1, %p2666_p3 }
  0x70   : > { %p2664_p0 = pneg %p2663_p13  ;;  %p2670_p8 = por %p2669_p6, %p2668_p2 }
  0x72   : > { %p2671_p5 = pnand %p2670_p8, %p2664_p0 }
  0x74   : > { %2674 = shalt.err (!%p2671_p5)
}
  0x75   : > { %s2675_s5 = scalar_lea.vmem %s3143_s21, 2048  ;;  %s2884_s18 = smov [#allocation8]  }
  0x76   : > { %p2676_p4 = scmp.ne.s32.totalorder %s3143_s21, %s2675_s5  ;;  %s2680_s14 = sshll.u32 %s2884_s18, 4  ;;  %s2681_s14 = int_to_ptr.vmem [resolvable:$false] %s2680_s14 }
  0x77   : > { %s2682_s19 = scalar_lea.vmem %s2681_s14, 4096  ;;  %p2683_p7 = scmp.lt.s32.totalorder %s3143_s21, %s2681_s14 }
  0x78   : > { %p2678_p9 = pnand %p2676_p4, %p3109_p12  ;;  %p2684_p13 = scmp.lt.s32.totalorder %s2682_s19, %s2675_s5 }
  0x7a   : > { %p2679_p11 = pneg %p2678_p9  ;;  %p2685_p3 = por %p2684_p13, %p2683_p7 }
  0x7c   : > { %p2686_p1 = pnand %p2685_p3, %p2679_p11 }
  0x7e   : > { %2689 = shalt.err (!%p2686_p1)
}
  0x7f   : > { %2456 = dma.hbm_to_vmem [thread:$0]  (!%p3098_p10), %s3140_s17, 2048, %s3143_s21, %s3043_s6, %s4311_s22, %s4311_s22, %s4312_s23  }
  0x80   : > { %s3171_s1 = sadd.s32 4294967295, %s2878_s11   ;;  %s2195_s15 = sadd.s32 4294967294, %s2878_s11  }
  0x81   : > { %p59_p0 = scmp.ne.s32.totalorder %s2854_s28, %s2850_s27  ;;  %p4317_p2 = scmp.eq.s32.totalorder %s3171_s1, 0 }
  0x82   : > { %p106_p6 = scmp.ne.s32.totalorder %s2842_s25, %s2838_s24  ;;  %p184_p8 = scmp.eq.s32.totalorder %s3171_s1, 3 }
  0x83   : > { %p218_p5 = scmp.eq.s32.totalorder %s2195_s15, 3  ;;  %p3182_p4 = por %p4317_p2, %p59_p0 }
  0x84   : > { %p3188_p9 = por %p106_p6, %p4317_p2  ;;  %p4352_p11 = scmp.ne.s32.totalorder %s2858_s29, %s2854_s28 }
  0x85   : > { %s4350_s8 = scalar_select %p3182_p4, 1, 0 }
  0x86   : > { %s4351_s17 = scalar_select %p3188_p9, 1, 0 }
  0x87   : > { %p3195_p7 = por %p184_p8, %p4352_p11  ;;  %p3199_p13 = por %p218_p5, %p59_p0 }
  0x88   : > { %p2196_p3 = scmp.ge.s32.totalorder %s2878_s11, 1  ;;  %p253_p1 = scmp.lt.s32.totalorder %s2878_s11, 5 }
  0x89   : > { %s4353_s21 = scalar_select %p3195_p7, 1, 0 }
  0x8a   : > { %s4354_s24 = scalar_select %p3199_p13, 1, 0 }
  0x8b   : > { %p3205_p10 = pnand %p2196_p3, %p253_p1  ;;  %s2885_s18 = smov [#allocation5]  }
  0x8c   : > { %s265_s14 = sshll.u32 %s2885_s18, 4  ;;  %s348_s15 = scalar_lea.vmem [#allocation9], %s3088_s16  ;;  %s3209_s14 = int_to_ptr.vmem [resolvable:$true] %s265_s14 }
  0x8d   : > { %s4355_s5 = scalar_select %p3205_p10, 1, 0 }
  0x8e   : > { %p2443_p6 = pneg %p3205_p10  ;;  %s355_s22 = sshll.u32 %s348_s15, 4  ;;  %s3226_s22 = int_to_ptr.vmem [resolvable:$true] %s355_s22 }
  0x8f   : > { %s4357_s2 = sld [smem:[#allocation30_spill]]  ;;  %s4358_s10 = sld [smem:[#allocation27_spill]] }
  0x90   : > { %p3215_p8 = pnand %p2443_p6, %p4317_p2 }
  0x92   : > { %p2692_p5 = pneg %p3215_p8 }
  0x95   : > { %s3224_s3 = scalar_lea.hbm %s4357_s2, %s3075_s7  ;;  %s4359_s12 = smov %s4358_s10 }
  0x96   : > { %s2690_s9 = scalar_lea.hbm %s4358_s10, 6144 }
  0x97   : > { %p2691_p0 = scmp.ne.s32.totalorder %s4359_s12, %s2690_s9  ;;  %p2697_p1 = scmp.lt.u32.totalorder %s2690_s9, %s4359_s12 }
  0x99   : > { %p2693_p11 = pnand %p2692_p5, %p2691_p0 }
  0x9b   : > { %p2694_p3 = pneg %p2693_p11 }
  0x9d   : > { %p2699_p6 = pnand %p2697_p1, %p2694_p3 }
  0x9f   : > { %2702 = shalt.err (!%p2699_p6)
}
  0xa0   : > { %s2703_s0 = scalar_lea.vmem %s3209_s14, 6144  ;;  %p2711_p9 = scmp.lt.s32.totalorder %s3209_s14, %s3209_s14 }
  0xa1   : > { %p2704_p2 = scmp.ne.s32.totalorder %s3209_s14, %s2703_s0  ;;  %p2712_p4 = scmp.lt.s32.totalorder %s2703_s0, %s2703_s0 }
  0xa3   : > { %p2706_p13 = pnand %p2704_p2, %p2692_p5  ;;  %p2713_p10 = por %p2712_p4, %p2711_p9 }
  0xa5   : > { %p2707_p7 = pneg %p2706_p13 }
  0xa7   : > { %p2714_p12 = pnand %p2713_p10, %p2707_p7 }
  0xa9   : > { %2717 = shalt.err (!%p2714_p12)
}
  0xaa   : > { %s2886_s29 = smov 384   ;;  %s2887_s9 = smov 24  }
  0xab   : > { %2446 = dma.hbm_to_vmem [thread:$0]  (!%p3215_p8), %s4359_s12, 6144, %s3209_s14, [#allocation6], %s2886_s29, %s2886_s29, %s2887_s9  }
  0xac   : > { %s2718_s23 = scalar_lea.hbm %s3224_s3, 2048  ;;  %p4360_p13 = scmp.ne.s32.totalorder %s4348_s20, 0 }
  0xad   : > { %p2719_p2 = scmp.ne.s32.totalorder %s3224_s3, %s2718_s23  ;;  %s2723_s18 = scalar_lea.hbm %s4357_s2, 4096 }
  0xae   : > { %p2724_p12 = scmp.lt.u32.totalorder %s3224_s3, %s4357_s2  ;;  %p2725_p9 = scmp.lt.u32.totalorder %s2723_s18, %s2718_s23 }
  0xaf   : > { %p2721_p4 = pnand %p2719_p2, %p4360_p13  ;;  %p2727_p0 = scmp.lt.u32.totalorder %s2718_s23, %s3224_s3 }
  0xb0   : > { %p2726_p7 = por %p2725_p9, %p2724_p12 }
  0xb1   : > { %p2722_p10 = pneg %p2721_p4 }
  0xb2   : > { %p2728_p5 = por %p2727_p0, %p2726_p7 }
  0xb4   : > { %p2729_p11 = pnand %p2728_p5, %p2722_p10 }
  0xb6   : > { %2732 = shalt.err (!%p2729_p11)
}
  0xb7   : > { %s2733_s14 = scalar_lea.vmem %s3226_s22, 2048  ;;  %s2888_s19 = smov [#allocation9]  }
  0xb8   : > { %p2734_p8 = scmp.ne.s32.totalorder %s3226_s22, %s2733_s14  ;;  %s2738_s0 = sshll.u32 %s2888_s19, 4  ;;  %s2739_s0 = int_to_ptr.vmem [resolvable:$false] %s2738_s0 }
  0xb9   : > { %s2740_s29 = scalar_lea.vmem %s2739_s0, 4096  ;;  %p2741_p6 = scmp.lt.s32.totalorder %s3226_s22, %s2739_s0 }
  0xba   : > { %p2736_p3 = pnand %p2734_p8, %p4360_p13  ;;  %p2742_p2 = scmp.lt.s32.totalorder %s2740_s29, %s2733_s14 }
  0xbc   : > { %p2737_p1 = pneg %p2736_p3  ;;  %p2743_p4 = por %p2742_p2, %p2741_p6 }
  0xbe   : > { %p2744_p12 = pnand %p2743_p4, %p2737_p1 }
  0xc0   : > { %2747 = shalt.err (!%p2744_p12)
}
  0xc1   : > { %p4361_p10 = scmp.ne.s32.totalorder %s4347_s4, 0  ;;  %s4362_s9 = smov 8  }
  0xc2   : > { %s4363_s10 = smov 128   ;;  %p4364_p13 = scmp.ne.s32.totalorder %s4355_s5, 0 }
  0xc3   : > { %2459 = dma.hbm_to_vmem [thread:$0]  (!%p4361_p10), %s3224_s3, 2048, %s3226_s22, %s3043_s6, %s4363_s10, %s4363_s10, %s4362_s9  }
  0xc4   : > { %367 = sbr.rel (%p4364_p13) target bundleno = 1161 (0x489), region = 40  ;;  %s369_s20 = sand.u32 (!%p4364_p13), 1, %s3171_s1  }
  0xc5   : > { %s3278_s13 = sand.u32 (!%p4364_p13), 1, %s2854_s28   ;;  %s370_s4 = scalar_lea.sflag (!%p4364_p13), [#allocation3], %s369_s20 }
  0xc6   : > { %s2213_s23 = sshll.u32 (!%p4364_p13), %s3278_s13, 7  ;;  %p4365_p9 = scmp.ne.s32.totalorder (!%p4364_p13), %s4350_s8, 0 }
  0xc7   : > { %s3283_s7 = scalar_lea.vmem (!%p4364_p13), [#allocation2], %s2213_s23 }
  0xcb   : > { %2821 = dma.done.wait (%p4365_p9), %s370_s4, 2048  }
  0xcc   : > { %2823 = vsyncadd (%p4365_p9), %s370_s4, 4294965248  ;;  %p4366_p7 = scmp.eq.s32.totalorder %s3171_s1, 0 }
  0xce   : > { %2825 = dma.done.wait (%p4366_p7), [#allocation6], 6144   ;;  %p4367_p0 = pmov %p4366_p7 }
  0xcf   : > { %s384_s3 = sand.u32 1, %s2842_s25   ;;  %p4368_p5 = scmp.ne.s32.totalorder %s4351_s17, 0 }
  0xd0   : > { %2827 = vsyncadd (%p4367_p0), [#allocation6], 4294961152  ;;  %s3294_s6 = sshll.u32 %s384_s3, 7 }
  0xd1   : > { %s3297_s22 = scalar_lea.vmem [#allocation7], %s3294_s6 }
  0xd2   : > { %2829 = dma.done.wait (%p4368_p5), %s370_s4, 6144  }
  0xd3   : > { %2831 = vsyncadd (%p4368_p5), %s370_s4, 4294961152  ;;  %v3304_v0 = vld [vmem:[%s3283_s7] sm:$0xff]  ;;  %v3307_v1 = vld [vmem:[%s3283_s7 + $0x8] sm:$0xff]  ;;  %s2218_s1 = sshll.u32 %s3278_s13, 8  ;;  %s2890_s8 = smov 127   ;;  %vm1282_vm0 = vcmask 523264  }
  0xd4   : > { %v3310_v2 = vld [vmem:[%s3283_s7 + $0x10] sm:$0xff]  ;;  %v480_v3 = vmul.f32 %v3304_v0, %v3304_v0  ;;  %v3317_v5 = vld [vmem:[%s3283_s7 + $0x18] sm:$0xff]  ;;  %v481_v6 = vmul.f32 %v3307_v1, %v3307_v1  ;;  %v3324_v8 = vld [vmem:[%s3283_s7 + $0x20] sm:$0xff]  ;;  %s2891_s17 = smov 1   ;;  %s3432_s5 = scalar_lea.vmem [#allocation12], %s2218_s1 }
  0xd5   : > { %v482_v4 = vmul.f32 %v3310_v2, %v3310_v2  ;;  %v483_v7 = vmul.f32 %v3317_v5, %v3317_v5  ;;  %v3327_v9 = vld [vmem:[%s3283_s7 + $0x28] sm:$0xff]  ;;  %v596_v11 = vld [vmem:[#allocation5 + $0x20] sm:$0xff]  ;;  %v3330_v12 = vld [vmem:[%s3283_s7 + $0x30] sm:$0xff]  ;;  %v484_v17 = vmul.f32 %v3324_v8, %v3324_v8  ;;  %s2892_s30 = smov 64   ;;  %s3659_s18 = scalar_lea.vmem [#allocation8], %s3294_s6 }
  0xd6   : > { %496 = vadd.xlane.f32.xlu0 %v480_v3  ;;  %v593_v10 = vld [vmem:[#allocation5 + $0x8] sm:$0xff]  ;;  %v592_v14 = vld [vmem:[#allocation5] sm:$0xff]  ;;  %v595_v15 = vld [vmem:[#allocation5 + $0x18] sm:$0xff]  ;;  %v485_v18 = vmul.f32 %v3327_v9, %v3327_v9  ;;  %v486_v31 = vmul.f32 %v3330_v12, %v3330_v12  ;;  %s3668_s16 = scalar_lea.vmem [#allocation9], %s3294_s6  ;;  %s3681_s15 = scalar_lea.vmem [#allocation10], %s2218_s1 }
  0xd7   : > { %500 = vadd.xlane.f32.xlu1 %v482_v4  ;;  %v2365_v13 = vpack.c.bf16 %v596_v11, %v593_v10  ;;  %v599_v16 = vld [vmem:[#allocation5 + $0x38] sm:$0xff]  ;;  %v2367_v19 = vpack.c.bf16 %v595_v15, %v592_v14  ;;  %v602_v20 = vld [vmem:[#allocation5 + $0x50] sm:$0xff]  ;;  %v601_v22 = vld [vmem:[#allocation5 + $0x48] sm:$0xff]  ;;  %s4058_s14 = scalar_lea.vmem [#allocation11], %s2213_s23  ;;  %s1627_s19 = scalar_lea.sflag [#allocation4], %s3278_s13 }
  0xd8   : > { %v598_v21 = vld [vmem:[#allocation5 + $0x30] sm:$0xff]  ;;  %v3337_v23 = vld [vmem:[%s3283_s7 + $0x38] sm:$0xff]  ;;  %v2369_v24 = vpack.c.bf16 %v602_v20, %v599_v16  ;;  %v605_v25 = vld [vmem:[#allocation5 + $0x68] sm:$0xff]  ;;  %p4369_p11 = scmp.ne.s32.totalorder %s4353_s21, 0 }
  0xd9   : > { %2366 = vmatprep.subr.bf16.mxu0 %v2365_v13  ;;  %v608_v26 = vld [vmem:[#allocation5 + $0x80] sm:$0xff]  ;;  %v2371_v27 = vpack.c.bf16 %v601_v22, %v598_v21  ;;  %v607_v30 = vld [vmem:[#allocation5 + $0x78] sm:$0xff]  ;;  %v487_v32 = vmul.f32 %v3337_v23, %v3337_v23  ;;  %v614_v34 = vld [vmem:[#allocation5 + $0xb0] sm:$0xff]  ;;  %s4370_s0 = sld [smem:[#allocation18_spill]] (%p4369_p11)  ;;  %s4371_s29 = sld [smem:[#allocation19_spill]] (%p4369_p11) }
  0xda   : > { %498 = vadd.xlane.f32.xlu0 %v481_v6  ;;  %2368 = vmatpush1.bf16.msra.mxu0 %v2367_v19  ;;  %v2373_v28 = vpack.c.bf16 %v608_v26, %v605_v25  ;;  %v604_v29 = vld [vmem:[#allocation5 + $0x60] sm:$0xff]  ;;  %v611_v33 = vld [vmem:[#allocation5 + $0x98] sm:$0xff]  ;;  %v3347_v36 = vld [vmem:[%s3283_s7 + $0x48] sm:$0xff]  ;;  %s4372_s3 = sld [smem:[#allocation31_spill]] (%p4369_p11) }
  0xdb   : > { %502 = vadd.xlane.f32.xlu1 %v483_v7  ;;  %2370 = vmatprep.subr.bf16.mxu0 %v2369_v24  ;;  %v3344_v35 = vld [vmem:[%s3283_s7 + $0x40] sm:$0xff]  ;;  %v2375_v37 = vpack.c.bf16 %v607_v30, %v604_v29  ;;  %v610_v38 = vld [vmem:[#allocation5 + $0x90] sm:$0xff]  ;;  %v2377_v39 = vpack.c.bf16 %v614_v34, %v611_v33  ;;  %v613_v40 = vld [vmem:[#allocation5 + $0xa8] sm:$0xff]  ;;  %v489_v44 = vmul.f32 %v3347_v36, %v3347_v36 }
  0xdc   : > { %v594_v41 = vld [vmem:[#allocation5 + $0x10] sm:$0xff]  ;;  %v597_v42 = vld [vmem:[#allocation5 + $0x28] sm:$0xff]  ;;  %v488_v43 = vmul.f32 %v3344_v35, %v3344_v35  ;;  %v620_v47 = vld [vmem:[#allocation5 + $0xe0] sm:$0xff]  ;;  %v2379_v50 = vpack.c.bf16 %v613_v40, %v610_v38 }
  0xdd   : > { %v2397_v45 = vpack.c.bf16 %v597_v42, %v594_v41  ;;  %v617_v46 = vld [vmem:[#allocation5 + $0xc8] sm:$0xff]  ;;  %v3354_v48 = vld [vmem:[%s3283_s7 + $0x50] sm:$0xff]  ;;  %v3357_v49 = vld [vmem:[%s3283_s7 + $0x58] sm:$0xff]  ;;  %v2889_v41 = vmov 0.0  }
  0xde   : > { %504 = vadd.xlane.f32.xlu0 %v484_v17  ;;  %2372 = vmatpush1.bf16.msra.mxu0 %v2371_v27  ;;  %v616_v51 = vld [vmem:[#allocation5 + $0xc0] sm:$0xff]  ;;  %v2381_v52 = vpack.c.bf16 %v620_v47, %v617_v46  ;;  %v619_v53 = vld [vmem:[#allocation5 + $0xd8] sm:$0xff]  ;;  %v490_v56 = vmul.f32 %v3354_v48, %v3354_v48  ;;  %v491_v57 = vmul.f32 %v3357_v49, %v3357_v49  ;;  %v626_v60 = vld [vmem:[#allocation5 + $0x110] sm:$0xff] }
  0xdf   : > { %506 = vadd.xlane.f32.xlu1 %v485_v18  ;;  %2374 = vmatprep.subr.bf16.mxu0 %v2373_v28  ;;  %v600_v54 = vld [vmem:[#allocation5 + $0x40] sm:$0xff]  ;;  %v603_v55 = vld [vmem:[#allocation5 + $0x58] sm:$0xff]  ;;  %v3367_v62 = vld [vmem:[%s3283_s7 + $0x68] sm:$0xff]  ;;  %v2383_v63 = vpack.c.bf16 %v619_v53, %v616_v51  ;;  %s2264_s9 = sshll.u32 (%p4369_p11), %s4370_s0, 4  ;;  %s2265_s10 = sshll.u32 (%p4369_p11), %s4371_s29, 6 }
  0xe0   : > { %2398 = vmatprep.subr.bf16.mxu1 %v2397_v45  ;;  %v2401_v58 = vpack.c.bf16 %v603_v55, %v600_v54  ;;  %v623_v59 = vld [vmem:[#allocation5 + $0xf8] sm:$0xff]  ;;  %v3364_v61 = vld [vmem:[%s3283_s7 + $0x60] sm:$0xff]  ;;  %v622_v3 = vld [vmem:[#allocation5 + $0xf0] sm:$0xff]  ;;  %v493_v13 = vmul.f32 %v3367_v62, %v3367_v62  ;;  %704 = vmatprep.mubr.f32.mxu0 %v2889_v41  ;;  %s1640_s20 = sadd.s32 (%p4369_p11), %s2265_s10, %s2264_s9 }
  0xe1   : > { %2400 = vmatpush3.bf16.msra.mxu1 %v2397_v45  ;;  %v2385_v4 = vpack.c.bf16 %v626_v60, %v623_v59  ;;  %v625_v6 = vld [vmem:[#allocation5 + $0x108] sm:$0xff]  ;;  %v606_v7 = vld [vmem:[#allocation5 + $0x70] sm:$0xff]  ;;  %v492_v11 = vmul.f32 %v3364_v61, %v3364_v61  ;;  %v632_v16 = vld [vmem:[#allocation5 + $0x140] sm:$0xff]  ;;  %s2266_s23 = sshll.u32 (%p4369_p11), %s1640_s20, 3 }
  0xe2   : > { %508 = vadd.xlane.f32.xlu0 %v486_v31  ;;  %2376 = vmatpush1.bf16.msra.mxu0 %v2375_v37  ;;  %v609_v10 = vld [vmem:[#allocation5 + $0x88] sm:$0xff]  ;;  %v3374_v17 = vld [vmem:[%s3283_s7 + $0x70] sm:$0xff]  ;;  %v3377_v18 = vld [vmem:[%s3283_s7 + $0x78] sm:$0xff]  ;;  %v2387_v19 = vpack.c.bf16 %v625_v6, %v622_v3  ;;  %s4095_s6 = scalar_lea.vmem (%p4369_p11), %s4372_s3, %s2266_s23 }
  0xe3   : > { %510 = vadd.xlane.f32.xlu1 %v487_v32  ;;  %2378 = vmatprep.subr.bf16.mxu0 %v2377_v39  ;;  %v2405_v14 = vpack.c.bf16 %v609_v10, %v606_v7  ;;  %v629_v15 = vld [vmem:[#allocation5 + $0x128] sm:$0xff]  ;;  %v628_v20 = vld [vmem:[#allocation5 + $0x120] sm:$0xff]  ;;  %v631_v22 = vld [vmem:[#allocation5 + $0x138] sm:$0xff]  ;;  %v494_v26 = vmul.f32 %v3374_v17, %v3374_v17  ;;  %v495_v27 = vmul.f32 %v3377_v18, %v3377_v18 }
  0xe4   : > { %2402 = vmatprep.subr.bf16.mxu1 %v2401_v58  ;;  %v2389_v21 = vpack.c.bf16 %v632_v16, %v629_v15  ;;  %v612_v24 = vld [vmem:[#allocation5 + $0xa0] sm:$0xff]  ;;  %v615_v25 = vld [vmem:[#allocation5 + $0xb8] sm:$0xff]  ;;  %v638_v30 = vld [vmem:[#allocation5 + $0x170] sm:$0xff]  ;;  %v2391_v31 = vpack.c.bf16 %v631_v22, %v628_v20 }
  0xe5   : > { %2404 = vmatpush3.bf16.msra.mxu1 %v2401_v58  ;;  %v2409_v28 = vpack.c.bf16 %v615_v25, %v612_v24  ;;  %v635_v29 = vld [vmem:[#allocation5 + $0x158] sm:$0xff]  ;;  %v634_v32 = vld [vmem:[#allocation5 + $0x150] sm:$0xff]  ;;  %v637_v34 = vld [vmem:[#allocation5 + $0x168] sm:$0xff] }
  0xe6   : > { %512 = vadd.xlane.f32.xlu0 %v488_v43  ;;  %2380 = vmatpush1.bf16.msra.mxu0 %v2379_v50  ;;  %v2393_v33 = vpack.c.bf16 %v638_v30, %v635_v29  ;;  %v618_v37 = vld [vmem:[#allocation5 + $0xd0] sm:$0xff]  ;;  %v621_v38 = vld [vmem:[#allocation5 + $0xe8] sm:$0xff]  ;;  %v2395_v40 = vpack.c.bf16 %v637_v34, %v634_v32  ;;  %v624_v42 = vld [vmem:[#allocation5 + $0x100] sm:$0xff] }
  0xe7   : > { %514 = vadd.xlane.f32.xlu1 %v489_v44  ;;  %2382 = vmatprep.subr.bf16.mxu0 %v2381_v52  ;;  %v2413_v39 = vpack.c.bf16 %v621_v38, %v618_v37  ;;  %v627_v43 = vld [vmem:[#allocation5 + $0x118] sm:$0xff]  ;;  %v630_v45 = vld [vmem:[#allocation5 + $0x130] sm:$0xff]  ;;  %v633_v46 = vld [vmem:[#allocation5 + $0x148] sm:$0xff] }
  0xe8   : > { %2406 = vmatprep.subr.bf16.mxu1 %v2405_v14  ;;  %v2417_v44 = vpack.c.bf16 %v627_v43, %v624_v42  ;;  %v636_v47 = vld [vmem:[#allocation5 + $0x160] sm:$0xff]  ;;  %v2421_v50 = vpack.c.bf16 %v633_v46, %v630_v45  ;;  %v639_v51 = vld [vmem:[#allocation5 + $0x178] sm:$0xff] }
  0xe9   : > { %2408 = vmatpush3.bf16.msra.mxu1 %v2405_v14  ;;  %v2425_v52 = vpack.c.bf16 %v639_v51, %v636_v47 }
  0xea   : > { %516 = vadd.xlane.f32.xlu0 %v490_v56  ;;  %2384 = vmatpush1.bf16.msra.mxu0 %v2383_v63 }
  0xeb   : > { %518 = vadd.xlane.f32.xlu1 %v491_v57  ;;  %2386 = vmatprep.subr.bf16.mxu0 %v2385_v4 }
  0xec   : > { %2410 = vmatprep.subr.bf16.mxu1 %v2409_v28 }
  0xed   : > { %2412 = vmatpush3.bf16.msra.mxu1 %v2409_v28 }
  0xee   : > { %520 = vadd.xlane.f32.xlu0 %v492_v11  ;;  %2388 = vmatpush1.bf16.msra.mxu0 %v2387_v19 }
  0xef   : > { %522 = vadd.xlane.f32.xlu1 %v493_v13  ;;  %2390 = vmatprep.subr.bf16.mxu0 %v2389_v21 }
  0xf0   : > { %2414 = vmatprep.subr.bf16.mxu1 %v2413_v39 }
  0xf1   : > { %2416 = vmatpush3.bf16.msra.mxu1 %v2413_v39 }
  0xf2   : > { %524 = vadd.xlane.f32.xlu0 %v494_v26  ;;  %2392 = vmatpush1.bf16.msra.mxu0 %v2391_v31 }
  0xf3   : > { %526 = vadd.xlane.f32.xlu1 %v495_v27  ;;  %2394 = vmatprep.subr.bf16.mxu0 %v2393_v33 }
  0xf4   : > { %2418 = vmatprep.subr.bf16.mxu1 %v2417_v44 }
  0xf5   : > { %2420 = vmatpush3.bf16.msra.mxu1 %v2417_v44 }
  0xf6   : > { %2396 = vmatpush1.bf16.msra.mxu0 %v2395_v40  ;;  %2422 = vmatprep.subr.bf16.mxu1 %v2421_v50 }
  0xf9   : > { %2424 = vmatpush3.bf16.msra.mxu1 %v2421_v50 }
  0xfa   : > { %2426 = vmatprep.subr.bf16.mxu1 %v2425_v52 }
  0xfd   : > { %2428 = vmatpush3.bf16.msra.mxu1 %v2425_v52 }
 0x163   : > { %v497_v53 = vpop.xlane.xlu0 %496 }
 0x164   : > { %v501_v54 = vpop.xlane.xlu1 %500  ;;  %v528_v55 = vmax.f32 %v497_v53, 1e-24 }
 0x165   : > { %v530_v56 = vmax.f32 %v501_v54, 1e-24 }
 0x166   : > { %2568 = vrsqrt.f32 %v528_v55 }
 0x167   : > { %v499_v57 = vpop.xlane.xlu0 %498  ;;  %2570 = vrsqrt.f32 %v530_v56 }
 0x168   : > { %v503_v58 = vpop.xlane.xlu1 %502  ;;  %v529_v59 = vmax.f32 %v499_v57, 1e-24 }
 0x169   : > { %v531_v60 = vmax.f32 %v503_v58, 1e-24 }
 0x16a   : > { %2572 = vrsqrt.f32 %v529_v59 }
 0x16b   : > { %2574 = vrsqrt.f32 %v531_v60  ;;  %v505_v63 = vpop.xlane.xlu0 %504 }
 0x16c   : > { %v507_v3 = vpop.xlane.xlu1 %506  ;;  %v532_v4 = vmax.f32 %v505_v63, 1e-24 }
 0x16d   : > { %v533_v6 = vmax.f32 %v507_v3, 1e-24 }
 0x16e   : > { %2576 = vrsqrt.f32 %v532_v4 }
 0x16f   : > { %2578 = vrsqrt.f32 %v533_v6  ;;  %v509_v7 = vpop.xlane.xlu0 %508 }
 0x170   : > { %v511_v10 = vpop.xlane.xlu1 %510  ;;  %v2569_v11 = vpop.eup %2568  ;;  %v534_v13 = vmax.f32 %v509_v7, 1e-24 }
 0x171   : > { %v535_v14 = vmax.f32 %v511_v10, 1e-24  ;;  %v2571_v15 = vpop.eup %2570  ;;  %v560_v16 = vmul.f32 11.313708, %v2569_v11 }
 0x172   : > { %v562_v19 = vmul.f32 11.313708, %v2571_v15  ;;  %2580 = vrsqrt.f32 %v534_v13 }
 0x173   : > { %v576_v20 = vmul.f32 %v560_v16, %v3304_v0  ;;  %2582 = vrsqrt.f32 %v535_v14  ;;  %v513_v21 = vpop.xlane.xlu0 %512 }
 0x174   : > { %v515_v22 = vpop.xlane.xlu1 %514  ;;  %v2573_v24 = vpop.eup %2572  ;;  %v536_v25 = vmax.f32 %v513_v21, 1e-24  ;;  %v578_v30 = vmul.f32 %v562_v19, %v3310_v2 }
 0x175   : > { %v537_v26 = vmax.f32 %v515_v22, 1e-24  ;;  %v2575_v27 = vpop.eup %2574  ;;  %v561_v28 = vmul.f32 11.313708, %v2573_v24  ;;  %705 = vmatmul.mubr.f32.vlgmr.msra.gmra.mrb[0].mxu0 %v576_v20  ;;  %2341 = vmatprep.mubr.f32.mxu1 %v576_v20 }
 0x176   : > { %710 = vmatprep.mubr.f32.mxu0 %v2889_v41  ;;  %v563_v29 = vmul.f32 11.313708, %v2575_v27  ;;  %2584 = vrsqrt.f32 %v536_v25 }
 0x177   : > { %v577_v31 = vmul.f32 %v561_v28, %v3307_v1  ;;  %2586 = vrsqrt.f32 %v537_v26  ;;  %v517_v0 = vpop.xlane.xlu0 %516 }
 0x178   : > { %v519_v32 = vpop.xlane.xlu1 %518  ;;  %v2577_v33 = vpop.eup %2576  ;;  %v538_v34 = vmax.f32 %v517_v0, 1e-24  ;;  %v579_v40 = vmul.f32 %v563_v29, %v3317_v5 }
 0x179   : > { %v539_v37 = vmax.f32 %v519_v32, 1e-24  ;;  %v2579_v38 = vpop.eup %2578  ;;  %711 = vmatmul.mubr.f32.gmra.mrb[2].mxu0 %v577_v31  ;;  %2342 = vmatmul.mubr.f32.vlgmr.msra.gmra.mrb[0].mxu1 %v577_v31  ;;  %v564_v39 = vmul.f32 11.313708, %v2577_v33 }
 0x17a   : > { %716 = vmatprep.mubr.f32.mxu0 %v2889_v41  ;;  %2344 = vmatprep.mubr.f32.mxu1 %v578_v30  ;;  %2588 = vrsqrt.f32 %v538_v34  ;;  %v565_v2 = vmul.f32 11.313708, %v2579_v38 }
 0x17b   : > { %2590 = vrsqrt.f32 %v539_v37  ;;  %v521_v42 = vpop.xlane.xlu0 %520  ;;  %v580_v44 = vmul.f32 %v564_v39, %v3324_v8 }
 0x17c   : > { %v523_v1 = vpop.xlane.xlu1 %522  ;;  %v2581_v43 = vpop.eup %2580  ;;  %v540_v45 = vmax.f32 %v521_v42, 1e-24  ;;  %v581_v51 = vmul.f32 %v565_v2, %v3327_v9 }
 0x17d   : > { %v541_v46 = vmax.f32 %v523_v1, 1e-24  ;;  %v2583_v47 = vpop.eup %2582  ;;  %717 = vmatmul.mubr.f32.gmra.mrb[4].mxu0 %v578_v30  ;;  %2345 = vmatmul.mubr.f32.gmra.mrb[2].mxu1 %v579_v40  ;;  %v566_v50 = vmul.f32 11.313708, %v2581_v43 }
 0x17e   : > { %722 = vmatprep.mubr.f32.mxu0 %v2889_v41  ;;  %v567_v5 = vmul.f32 11.313708, %v2583_v47  ;;  %2347 = vmatprep.mubr.f32.mxu1 %v580_v44  ;;  %2592 = vrsqrt.f32 %v540_v45 }
 0x17f   : > { %2594 = vrsqrt.f32 %v541_v46  ;;  %v525_v52 = vpop.xlane.xlu0 %524  ;;  %v582_v55 = vmul.f32 %v566_v50, %v3330_v12 }
 0x180   : > { %v527_v53 = vpop.xlane.xlu1 %526  ;;  %v2585_v54 = vpop.eup %2584  ;;  %v542_v8 = vmax.f32 %v525_v52, 1e-24  ;;  %v583_v59 = vmul.f32 %v567_v5, %v3337_v23  ;;  %v3543_v52 = vld [vmem:[%s3297_s22 + $0x48] sm:$0xff] }
 0x181   : > { %v543_v56 = vmax.f32 %v527_v53, 1e-24  ;;  %v2587_v57 = vpop.eup %2586  ;;  %723 = vmatmul.mubr.f32.gmra.mrb[6].mxu0 %v579_v40  ;;  %2348 = vmatmul.mubr.f32.gmra.mrb[4].mxu1 %v581_v51  ;;  %v568_v58 = vmul.f32 11.313708, %v2585_v54 }
 0x182   : > { %728 = vmatprep.mubr.f32.mxu0 %v2889_v41  ;;  %2350 = vmatprep.mubr.f32.mxu1 %v582_v55  ;;  %2596 = vrsqrt.f32 %v542_v8  ;;  %v569_v60 = vmul.f32 11.313708, %v2587_v57 }
 0x183   : > { %2598 = vrsqrt.f32 %v543_v56  ;;  %v584_v63 = vmul.f32 %v568_v58, %v3344_v35 }
 0x184   : > { %v2589_v9 = vpop.eup %2588  ;;  %v585_v6 = vmul.f32 %v569_v60, %v3347_v36 }
 0x185   : > { %v2591_v3 = vpop.eup %2590  ;;  %729 = vmatmul.mubr.f32.gmra.mrb[8].mxu0 %v580_v44  ;;  %2351 = vmatmul.mubr.f32.gmra.mrb[6].mxu1 %v583_v59  ;;  %v570_v12 = vmul.f32 11.313708, %v2589_v9  ;;  %v3577_v9 = vld [vmem:[%s3297_s22 + $0x68] sm:$0xff] }
 0x186   : > { %734 = vmatprep.mubr.f32.mxu0 %v2889_v41  ;;  %v571_v4 = vmul.f32 11.313708, %v2591_v3  ;;  %2353 = vmatprep.mubr.f32.mxu1 %v584_v63 }
 0x187   : > { %v586_v7 = vmul.f32 %v570_v12, %v3354_v48 }
 0x188   : > { %v2593_v23 = vpop.eup %2592  ;;  %v587_v13 = vmul.f32 %v571_v4, %v3357_v49 }
 0x189   : > { %v2595_v10 = vpop.eup %2594  ;;  %735 = vmatmul.mubr.f32.gmra.mrb[10].mxu0 %v581_v51  ;;  %2354 = vmatmul.mubr.f32.gmra.mrb[8].mxu1 %v585_v6  ;;  %v572_v11 = vmul.f32 11.313708, %v2593_v23  ;;  %v3595_v23 = vld [vmem:[%s3297_s22 + $0x78] sm:$0xff] }
 0x18a   : > { %740 = vmatprep.mubr.f32.mxu0 %v2889_v41  ;;  %2356 = vmatprep.mubr.f32.mxu1 %v586_v7  ;;  %v573_v35 = vmul.f32 11.313708, %v2595_v10 }
 0x18b   : > { %v588_v15 = vmul.f32 %v572_v11, %v3364_v61 }
 0x18c   : > { %v2597_v14 = vpop.eup %2596  ;;  %v589_v19 = vmul.f32 %v573_v35, %v3367_v62  ;;  %v946_v35 = vld [vmem:[%s3297_s22] sm:$0xff] }
 0x18d   : > { %v2599_v16 = vpop.eup %2598  ;;  %741 = vmatmul.mubr.f32.gmra.mrb[12].mxu0 %v582_v55  ;;  %2357 = vmatmul.mubr.f32.gmra.mrb[10].mxu1 %v587_v13  ;;  %v574_v36 = vmul.f32 11.313708, %v2597_v14 }
 0x18e   : > { %746 = vmatprep.mubr.f32.mxu0 %v2889_v41  ;;  %v575_v48 = vmul.f32 11.313708, %v2599_v16  ;;  %2359 = vmatprep.mubr.f32.mxu1 %v588_v15  ;;  %v963_v16 = vld [vmem:[%s3659_s18 + $0x8] sm:$0xff] }
 0x18f   : > { %v590_v20 = vmul.f32 %v574_v36, %v3374_v17  ;;  %v978_v36 = vld [vmem:[%s3668_s16] sm:$0xff] }
 0x190   : > { %v591_v49 = vmul.f32 %v575_v48, %v3377_v18 }
 0x191   : > { %747 = vmatmul.mubr.f32.gmra.mrb[14].mxu0 %v583_v59  ;;  %2360 = vmatmul.mubr.f32.gmra.mrb[12].mxu1 %v589_v19 }
 0x192   : > { %752 = vmatprep.mubr.f32.mxu0 %v2889_v41  ;;  %2362 = vmatprep.mubr.f32.mxu1 %v590_v20 }
 0x195   : > { %753 = vmatmul.mubr.f32.gmra.mrb[16].mxu0 %v584_v63  ;;  %2363 = vmatmul.mubr.f32.gmra.mrb[14].mxu1 %v591_v49 }
 0x196   : > { %758 = vmatprep.mubr.f32.mxu0 %v2889_v41 }
 0x199   : > { %759 = vmatmul.mubr.f32.gmra.mrb[18].mxu0 %v585_v6 }
 0x19a   : > { %764 = vmatprep.mubr.f32.mxu0 %v2889_v41 }
 0x19d   : > { %765 = vmatmul.mubr.f32.gmra.mrb[20].mxu0 %v586_v7 }
 0x19e   : > { %770 = vmatprep.mubr.f32.mxu0 %v2889_v41 }
 0x1a1   : > { %771 = vmatmul.mubr.f32.gmra.mrb[22].mxu0 %v587_v13  ;;  %v962_v13 = vld [vmem:[%s3659_s18] sm:$0xff] }
 0x1a2   : > { %776 = vmatprep.mubr.f32.mxu0 %v2889_v41 }
 0x1a5   : > { %777 = vmatmul.mubr.f32.gmra.mrb[24].mxu0 %v588_v15 }
 0x1a6   : > { %782 = vmatprep.mubr.f32.mxu0 %v2889_v41 }
 0x1a9   : > { %783 = vmatmul.mubr.f32.gmra.mrb[26].mxu0 %v589_v19  ;;  %v947_v19 = vld [vmem:[%s3297_s22 + $0x8] sm:$0xff] }
 0x1aa   : > { %788 = vmatprep.mubr.f32.mxu0 %v2889_v41 }
 0x1ad   : > { %789 = vmatmul.mubr.f32.gmra.mrb[28].mxu0 %v590_v20 }
 0x1ae   : > { %794 = vmatprep.mubr.f32.mxu0 %v2889_v41 }
 0x1b1   : > { %795 = vmatmul.mubr.f32.gmra.mrb[30].mxu0 %v591_v49 }
 0x248   : > { %v3416_v61 = vpop.f32.mrb[0].mxu0 }
 0x249   : > { %994 = vrot.lane.b32.xlu0 %v3416_v61, %s2890_s8  ;;  %v3420_v62 = vpop.f32.mrb[1].mxu0  ;;  %v1058_v48 = vmul.f32 %v946_v35, %v3416_v61 }
 0x24c   : > { %v3422_v17 = vpop.f32.mrb[2].mxu0  ;;  %v2343_v18 = vpop.f32.mrb[0].mxu1 }
 0x24d   : > { %1026 = vrot.lane.b32.xlu0 %v3416_v61, %s2891_s17  ;;  %996 = vrot.lane.b32.xlu1 %v3422_v17, %s2890_s8  ;;  %v3428_v41 = vpop.f32.mrb[3].mxu0  ;;  %1340 = vst.msk [vmem:[%s3432_s5 + $0x8] sm:$0xff] %vm1282_vm0, %v2343_v18  ;;  %v867_v21 = vpop.f32.mrb[1].mxu1 }
 0x24e   : > { %1339 = vst.msk [vmem:[%s3432_s5] sm:$0xff] %vm1282_vm0, %v867_v21 }
 0x250   : > { %v3438_v22 = vpop.f32.mrb[4].mxu0  ;;  %v2346_v24 = vpop.f32.mrb[2].mxu1 }
 0x251   : > { %1138 = vrot.lane.b32.xlu0 %v3420_v62, %s2890_s8  ;;  %1028 = vrot.lane.b32.xlu1 %v3422_v17, %s2891_s17  ;;  %v3444_v25 = vpop.f32.mrb[5].mxu0  ;;  %1342 = vst.msk [vmem:[%s3432_s5 + $0x18] sm:$0xff] %vm1282_vm0, %v2346_v24  ;;  %v877_v26 = vpop.f32.mrb[3].mxu1 }
 0x252   : > { %1341 = vst.msk [vmem:[%s3432_s5 + $0x10] sm:$0xff] %vm1282_vm0, %v877_v26 }
 0x254   : > { %v3450_v27 = vpop.f32.mrb[6].mxu0  ;;  %v2349_v28 = vpop.f32.mrb[4].mxu1 }
 0x255   : > { %1170 = vrot.lane.b32.xlu0 %v3420_v62, %s2891_s17  ;;  %1140 = vrot.lane.b32.xlu1 %v3428_v41, %s2890_s8  ;;  %v3456_v29 = vpop.f32.mrb[7].mxu0  ;;  %1344 = vst.msk [vmem:[%s3432_s5 + $0x28] sm:$0xff] %vm1282_vm0, %v2349_v28  ;;  %v887_v30 = vpop.f32.mrb[5].mxu1 }
 0x256   : > { %1343 = vst.msk [vmem:[%s3432_s5 + $0x20] sm:$0xff] %vm1282_vm0, %v887_v30 }
 0x258   : > { %v3462_v31 = vpop.f32.mrb[8].mxu0  ;;  %v2352_v0 = vpop.f32.mrb[6].mxu1 }
 0x259   : > { %1559 = vrot.lane.b32.xlu0 %v2343_v18, %s2892_s30  ;;  %1172 = vrot.lane.b32.xlu1 %v3428_v41, %s2891_s17  ;;  %v3467_v32 = vpop.f32.mrb[9].mxu0  ;;  %1346 = vst.msk [vmem:[%s3432_s5 + $0x38] sm:$0xff] %vm1282_vm0, %v2352_v0  ;;  %v897_v33 = vpop.f32.mrb[7].mxu1 }
 0x25a   : > { %1345 = vst.msk [vmem:[%s3432_s5 + $0x30] sm:$0xff] %vm1282_vm0, %v897_v33 }
 0x25c   : > { %v3473_v34 = vpop.f32.mrb[10].mxu0  ;;  %v3475_v37 = vpop.f32.mrb[8].mxu1 }
 0x25d   : > { %1557 = vrot.lane.b32.xlu0 %v867_v21, %s2892_s30  ;;  %998 = vrot.lane.b32.xlu1 %v3438_v22, %s2890_s8  ;;  %v3480_v38 = vpop.f32.mrb[11].mxu0  ;;  %1348 = vst.msk [vmem:[%s3432_s5 + $0x48] sm:$0xff] %vm1282_vm0, %v3475_v37  ;;  %v3485_v39 = vpop.f32.mrb[9].mxu1 }
 0x25e   : > { %1347 = vst.msk [vmem:[%s3432_s5 + $0x40] sm:$0xff] %vm1282_vm0, %v3485_v39 }
 0x260   : > { %v3490_v40 = vpop.f32.mrb[12].mxu0  ;;  %v3492_v2 = vpop.f32.mrb[10].mxu1 }
 0x261   : > { %1563 = vrot.lane.b32.xlu0 %v2346_v24, %s2892_s30  ;;  %1000 = vrot.lane.b32.xlu1 %v3450_v27, %s2890_s8  ;;  %v3497_v42 = vpop.f32.mrb[13].mxu0  ;;  %1350 = vst.msk [vmem:[%s3432_s5 + $0x58] sm:$0xff] %vm1282_vm0, %v3492_v2  ;;  %v3502_v1 = vpop.f32.mrb[11].mxu1 }
 0x262   : > { %1349 = vst.msk [vmem:[%s3432_s5 + $0x50] sm:$0xff] %vm1282_vm0, %v3502_v1 }
 0x264   : > { %v3507_v43 = vpop.f32.mrb[14].mxu0  ;;  %v3509_v44 = vpop.f32.mrb[12].mxu1 }
 0x265   : > { %1561 = vrot.lane.b32.xlu0 %v877_v26, %s2892_s30  ;;  %1032 = vrot.lane.b32.xlu1 %v3450_v27, %s2891_s17  ;;  %v3514_v45 = vpop.f32.mrb[15].mxu0  ;;  %1352 = vst.msk [vmem:[%s3432_s5 + $0x68] sm:$0xff] %vm1282_vm0, %v3509_v44  ;;  %v3519_v46 = vpop.f32.mrb[13].mxu1  ;;  %v979_v26 = vld [vmem:[%s3668_s16 + $0x8] sm:$0xff] }
 0x266   : > { %1351 = vst.msk [vmem:[%s3432_s5 + $0x60] sm:$0xff] %vm1282_vm0, %v3519_v46 }
 0x268   : > { %v3524_v47 = vpop.f32.mrb[16].mxu0  ;;  %v3526_v50 = vpop.f32.mrb[14].mxu1 }
 0x269   : > { %1030 = vrot.lane.b32.xlu0 %v3438_v22, %s2891_s17  ;;  %1144 = vrot.lane.b32.xlu1 %v3456_v29, %s2890_s8  ;;  %v3532_v5 = vpop.f32.mrb[17].mxu0  ;;  %1354 = vst.msk [vmem:[%s3432_s5 + $0x78] sm:$0xff] %vm1282_vm0, %v3526_v50  ;;  %v3537_v51 = vpop.f32.mrb[15].mxu1 }
 0x26a   : > { %1353 = vst.msk [vmem:[%s3432_s5 + $0x70] sm:$0xff] %vm1282_vm0, %v3537_v51 }
 0x26c   : > { %v3545_v53 = vpop.f32.mrb[18].mxu0 }
 0x26d   : > { %1142 = vrot.lane.b32.xlu0 %v3444_v25, %s2890_s8  ;;  %1176 = vrot.lane.b32.xlu1 %v3456_v29, %s2891_s17  ;;  %v762_v54 = vpop.f32.mrb[19].mxu0 }
 0x26e   : > { %v3552_v55 = vmul.f32 %v3543_v52, %v762_v54 }
 0x270   : > { %v3554_v8 = vpop.f32.mrb[20].mxu0 }
 0x271   : > { %1174 = vrot.lane.b32.xlu0 %v3444_v25, %s2891_s17  ;;  %1004 = vrot.lane.b32.xlu1 %v3473_v34, %s2890_s8  ;;  %v3560_v56 = vpop.f32.mrb[21].mxu0 }
 0x274   : > { %v3562_v57 = vpop.f32.mrb[22].mxu0 }
 0x275   : > { %1567 = vrot.lane.b32.xlu0 %v2349_v28, %s2892_s30  ;;  %1036 = vrot.lane.b32.xlu1 %v3473_v34, %s2891_s17  ;;  %v3567_v58 = vpop.f32.mrb[23].mxu0  ;;  %v1059_v28 = vmul.f32 %v947_v19, %v3422_v17 }
 0x278   : > { %v3569_v59 = vpop.f32.mrb[24].mxu0 }
 0x279   : > { %1565 = vrot.lane.b32.xlu0 %v887_v30, %s2892_s30  ;;  %1148 = vrot.lane.b32.xlu1 %v3480_v38, %s2890_s8  ;;  %v3574_v60 = vpop.f32.mrb[25].mxu0 }
 0x27c   : > { %v3579_v63 = vpop.f32.mrb[26].mxu0 }
 0x27d   : > { %1180 = vrot.lane.b32.xlu1 %v3480_v38, %s2891_s17  ;;  %1571 = vrot.lane.b32.xlu0 %v2352_v0, %s2892_s30  ;;  %v786_v3 = vpop.f32.mrb[27].mxu0 }
 0x27e   : > { %v3585_v12 = vmul.f32 %v3577_v9, %v786_v3 }
 0x280   : > { %v3587_v4 = vpop.f32.mrb[28].mxu0 }
 0x281   : > { %1569 = vrot.lane.b32.xlu0 %v897_v33, %s2892_s30  ;;  %1008 = vrot.lane.b32.xlu1 %v3507_v43, %s2890_s8  ;;  %v3592_v6 = vpop.f32.mrb[29].mxu0 }
 0x284   : > { %v3597_v7 = vpop.f32.mrb[30].mxu0 }
 0x285   : > { %1002 = vrot.lane.b32.xlu0 %v3462_v31, %s2890_s8  ;;  %1040 = vrot.lane.b32.xlu1 %v3507_v43, %s2891_s17  ;;  %v3603_v10 = vpop.f32.mrb[31].mxu0 }
 0x286   : > { %v3607_v11 = vmul.f32 %v3595_v23, %v3603_v10 }
 0x289   : > { %1034 = vrot.lane.b32.xlu0 %v3462_v31, %s2891_s17  ;;  %1152 = vrot.lane.b32.xlu1 %v3514_v45, %s2890_s8 }
 0x28d   : > { %1146 = vrot.lane.b32.xlu0 %v3467_v32, %s2890_s8  ;;  %1184 = vrot.lane.b32.xlu1 %v3514_v45, %s2891_s17 }
 0x291   : > { %1178 = vrot.lane.b32.xlu0 %v3467_v32, %s2891_s17  ;;  %1012 = vrot.lane.b32.xlu1 %v3545_v53, %s2890_s8 }
 0x295   : > { %1575 = vrot.lane.b32.xlu0 %v3475_v37, %s2892_s30  ;;  %1044 = vrot.lane.b32.xlu1 %v3545_v53, %s2891_s17 }
 0x299   : > { %1573 = vrot.lane.b32.xlu0 %v3485_v39, %s2892_s30  ;;  %1156 = vrot.lane.b32.xlu1 %v762_v54, %s2890_s8 }
 0x29d   : > { %1188 = vrot.lane.b32.xlu1 %v762_v54, %s2891_s17  ;;  %1579 = vrot.lane.b32.xlu0 %v3492_v2, %s2892_s30 }
 0x2a1   : > { %1577 = vrot.lane.b32.xlu0 %v3502_v1, %s2892_s30  ;;  %1016 = vrot.lane.b32.xlu1 %v3562_v57, %s2890_s8 }
 0x2a5   : > { %1006 = vrot.lane.b32.xlu0 %v3490_v40, %s2890_s8  ;;  %1048 = vrot.lane.b32.xlu1 %v3562_v57, %s2891_s17 }
 0x2a9   : > { %1038 = vrot.lane.b32.xlu0 %v3490_v40, %s2891_s17  ;;  %1160 = vrot.lane.b32.xlu1 %v3567_v58, %s2890_s8 }
 0x2ad   : > { %1150 = vrot.lane.b32.xlu0 %v3497_v42, %s2890_s8  ;;  %1192 = vrot.lane.b32.xlu1 %v3567_v58, %s2891_s17 }
 0x2b1   : > { %1182 = vrot.lane.b32.xlu0 %v3497_v42, %s2891_s17  ;;  %1020 = vrot.lane.b32.xlu1 %v3579_v63, %s2890_s8 }
 0x2b5   : > { %1583 = vrot.lane.b32.xlu0 %v3509_v44, %s2892_s30  ;;  %1052 = vrot.lane.b32.xlu1 %v3579_v63, %s2891_s17 }
 0x2b9   : > { %1581 = vrot.lane.b32.xlu0 %v3519_v46, %s2892_s30  ;;  %1164 = vrot.lane.b32.xlu1 %v786_v3, %s2890_s8 }
 0x2bb   : > { %v995_v14 = vpop.permute.xlu0 %994 }
 0x2bc   : > { %v1074_v15 = vmul.f32 %v995_v14, %v962_v13 }
 0x2bd   : > { %1196 = vrot.lane.b32.xlu1 %v786_v3, %s2891_s17  ;;  %1585 = vrot.lane.b32.xlu0 %v3537_v51, %s2892_s30  ;;  %v1202_v51 = vmul.f32 %v946_v35, %v3420_v62 }
 0x2be   : > { %v1090_v18 = vadd.f32 %v1074_v15, %v1058_v48  ;;  %v949_v48 = vld [vmem:[%s3297_s22 + $0x18] sm:$0xff] }
 0x2bf   : > { %v997_v20 = vpop.permute.xlu1 %996  ;;  %v1027_v49 = vpop.permute.xlu0 %1026 }
 0x2c0   : > { %v1075_v21 = vmul.f32 %v997_v20, %v963_v16  ;;  %v1106_v24 = vmul.f32 %v1027_v49, %v978_v36  ;;  %v981_v49 = vld [vmem:[%s3668_s16 + $0x18] sm:$0xff] }
 0x2c1   : > { %1010 = vrot.lane.b32.xlu0 %v3524_v47, %s2890_s8  ;;  %1024 = vrot.lane.b32.xlu1 %v3597_v7, %s2890_s8 }
 0x2c2   : > { %v1122_v30 = vadd.f32 %v1106_v24, %v1090_v18  ;;  %v1091_v61 = vadd.f32 %v1075_v21, %v1059_v28  ;;  %v964_v18 = vld [vmem:[%s3659_s18 + $0x10] sm:$0xff]  ;;  %v1061_v21 = vmul.f32 %v949_v48, %v3450_v27  ;;  %v1203_v24 = vmul.f32 %v947_v19, %v3428_v41 }
 0x2c3   : > { %v1029_v0 = vpop.permute.xlu1 %1028  ;;  %v1139_v33 = vpop.permute.xlu0 %1138  ;;  %v948_v28 = vld [vmem:[%s3297_s22 + $0x10] sm:$0xff] }
 0x2c4   : > { %1283 = vst.msk [vmem:[%s3681_s15] sm:$0xff] %vm1282_vm0, %v1122_v30  ;;  %v1107_v37 = vmul.f32 %v1029_v0, %v979_v26  ;;  %v1218_v46 = vmul.f32 %v1139_v33, %v962_v13  ;;  %v965_v13 = vld [vmem:[%s3659_s18 + $0x18] sm:$0xff]  ;;  %v980_v27 = vld [vmem:[%s3668_s16 + $0x10] sm:$0xff]  ;;  %v1060_v41 = vmul.f32 %v948_v28, %v3438_v22 }
 0x2c5   : > { %1042 = vrot.lane.b32.xlu0 %v3524_v47, %s2891_s17  ;;  %1056 = vrot.lane.b32.xlu1 %v3597_v7, %s2891_s17 }
 0x2c6   : > { %v1123_v17 = vadd.f32 %v1107_v37, %v1091_v61  ;;  %v1234_v15 = vadd.f32 %v1218_v46, %v1202_v51 }
 0x2c7   : > { %v1141_v39 = vpop.permute.xlu1 %1140  ;;  %v1171_v2 = vpop.permute.xlu0 %1170 }
 0x2c8   : > { %1284 = vst.msk [vmem:[%s3681_s15 + $0x8] sm:$0xff] %vm1282_vm0, %v1123_v17  ;;  %v1250_v54 = vmul.f32 %v1171_v2, %v978_v36  ;;  %v1219_v36 = vmul.f32 %v1141_v39, %v963_v16 }
 0x2c9   : > { %1154 = vrot.lane.b32.xlu0 %v3532_v5, %s2890_s8  ;;  %1168 = vrot.lane.b32.xlu1 %v3603_v10, %s2890_s8 }
 0x2ca   : > { %v3709_v20 = vadd.f32 %v1250_v54, %v1234_v15  ;;  %v1235_v39 = vadd.f32 %v1219_v36, %v1203_v24  ;;  %v3747_v15 = vld [vmem:[%s3297_s22 + $0x28] sm:$0xff] }
 0x2cb   : > { %v1173_v1 = vpop.permute.xlu1 %1172  ;;  %v1560_v44 = vpop.permute.xlu0 %1559  ;;  %v1063_v24 = vmul.f32 %v3747_v15, %v3473_v34  ;;  %v1205_v34 = vmul.f32 %v949_v48, %v3456_v29 }
 0x2cc   : > { %2246 = vst.msk [vmem:[%s3432_s5 + $0x88] sm:$0xff] %vm1282_vm0, %v1560_v44 }
 0x2cd   : > { %1186 = vrot.lane.b32.xlu0 %v3532_v5, %s2891_s17  ;;  %1200 = vrot.lane.b32.xlu1 %v3603_v10, %s2891_s17 }
 0x2cf   : > { %v999_v3 = vpop.permute.xlu1 %998  ;;  %v1558_v14 = vpop.permute.xlu0 %1557 }
 0x2d0   : > { %2245 = vst.msk [vmem:[%s3432_s5 + $0x80] sm:$0xff] %vm1282_vm0, %v1558_v14  ;;  %v1076_v37 = vmul.f32 %v999_v3, %v964_v18  ;;  %v3743_v3 = vld [vmem:[%s3659_s18 + $0x28] sm:$0xff]  ;;  %v1204_v14 = vmul.f32 %v948_v28, %v3444_v25 }
 0x2d1   : > { %1014 = vrot.lane.b32.xlu0 %v3554_v8, %s2890_s8  ;;  %1371 = vrot.lane.b32.xlu1 %v1122_v30, %s2892_s30  ;;  %v1251_v30 = vmul.f32 %v1173_v1, %v979_v26 }
 0x2d2   : > { %v1092_v46 = vadd.f32 %v1076_v37, %v1060_v41  ;;  %v3786_v41 = vld [vmem:[%s3659_s18 + $0x38] sm:$0xff] }
 0x2d3   : > { %v1001_v10 = vpop.permute.xlu1 %1000  ;;  %v1564_v62 = vpop.permute.xlu0 %1563  ;;  %v3729_v26 = vadd.f32 %v1251_v30, %v1235_v39 }
 0x2d4   : > { %v1077_v35 = vmul.f32 %v1001_v10, %v965_v13  ;;  %2248 = vst.msk [vmem:[%s3432_s5 + $0x98] sm:$0xff] %vm1282_vm0, %v1564_v62 }
 0x2d5   : > { %1046 = vrot.lane.b32.xlu0 %v3554_v8, %s2891_s17  ;;  %1452 = vrot.lane.b32.xlu1 %v3709_v20, %s2892_s30 }
 0x2d6   : > { %v1093_v61 = vadd.f32 %v1077_v35, %v1061_v21  ;;  %v3753_v21 = vld [vmem:[%s3668_s16 + $0x28] sm:$0xff] }
 0x2d7   : > { %v1033_v0 = vpop.permute.xlu1 %1032  ;;  %v1562_v33 = vpop.permute.xlu0 %1561 }
 0x2d8   : > { %v1109_v16 = vmul.f32 %v1033_v0, %v981_v49  ;;  %2247 = vst.msk [vmem:[%s3432_s5 + $0x90] sm:$0xff] %vm1282_vm0, %v1562_v33 }
 0x2d9   : > { %1158 = vrot.lane.b32.xlu0 %v3560_v56, %s2890_s8  ;;  %1373 = vrot.lane.b32.xlu1 %v1123_v17, %s2892_s30 }
 0x2da   : > { %v1125_v19 = vadd.f32 %v1109_v16, %v1093_v61 }
 0x2db   : > { %v1145_v2 = vpop.permute.xlu1 %1144  ;;  %v1031_v1 = vpop.permute.xlu0 %1030 }
 0x2dc   : > { %1286 = vst.msk [vmem:[%s3681_s15 + $0x18] sm:$0xff] %vm1282_vm0, %v1125_v19  ;;  %v1108_v44 = vmul.f32 %v1031_v1, %v980_v27  ;;  %v1221_v0 = vmul.f32 %v1145_v2, %v965_v13 }
 0x2dd   : > { %1190 = vrot.lane.b32.xlu0 %v3560_v56, %s2891_s17  ;;  %1454 = vrot.lane.b32.xlu1 %v3729_v26, %s2892_s30 }
 0x2de   : > { %v1124_v17 = vadd.f32 %v1108_v44, %v1092_v46  ;;  %v966_v46 = vld [vmem:[%s3659_s18 + $0x20] sm:$0xff] }
 0x2df   : > { %v1177_v22 = vpop.permute.xlu1 %1176  ;;  %v1143_v51 = vpop.permute.xlu0 %1142 }
 0x2e0   : > { %v1220_v54 = vmul.f32 %v1143_v51, %v964_v18  ;;  %1285 = vst.msk [vmem:[%s3681_s15 + $0x10] sm:$0xff] %vm1282_vm0, %v1124_v17  ;;  %v1253_v16 = vmul.f32 %v1177_v22, %v981_v49  ;;  %v950_v51 = vld [vmem:[%s3297_s22 + $0x20] sm:$0xff] }
 0x2e1   : > { %1018 = vrot.lane.b32.xlu0 %v3569_v59, %s2890_s8  ;;  %1375 = vrot.lane.b32.xlu1 %v1124_v17, %s2892_s30  ;;  %v3798_v17 = vld [vmem:[%s3668_s16 + $0x38] sm:$0xff] }
 0x2e2   : > { %v1236_v35 = vadd.f32 %v1220_v54, %v1204_v14 }
 0x2e3   : > { %v1005_v10 = vpop.permute.xlu1 %1004  ;;  %v1175_v62 = vpop.permute.xlu0 %1174 }
 0x2e4   : > { %v1079_v36 = vmul.f32 %v1005_v10, %v3743_v3  ;;  %v1252_v18 = vmul.f32 %v1175_v62, %v980_v27  ;;  %v1237_v27 = vadd.f32 %v1221_v0, %v1205_v34 }
 0x2e5   : > { %1050 = vrot.lane.b32.xlu0 %v3569_v59, %s2891_s17 }
 0x2e6   : > { %v3757_v30 = vadd.f32 %v1252_v18, %v1236_v35  ;;  %v1095_v33 = vadd.f32 %v1079_v36, %v1063_v24  ;;  %v3777_v29 = vadd.f32 %v1253_v16, %v1237_v27  ;;  %v982_v36 = vld [vmem:[%s3668_s16 + $0x20] sm:$0xff]  ;;  %v1062_v18 = vmul.f32 %v950_v51, %v3462_v31  ;;  %v971_v16 = vld [vmem:[%s3659_s18 + $0x48] sm:$0xff] }
 0x2e7   : > { %v1037_v25 = vpop.permute.xlu1 %1036  ;;  %v1568_v28 = vpop.permute.xlu0 %1567 }
 0x2e8   : > { %v1111_v61 = vmul.f32 %v1037_v25, %v3753_v21  ;;  %2250 = vst.msk [vmem:[%s3432_s5 + $0xa8] sm:$0xff] %vm1282_vm0, %v1568_v28  ;;  %1456 = vrot.lane.b32.xlu1 %v3757_v30, %s2892_s30 }
 0x2e9   : > { %1162 = vrot.lane.b32.xlu0 %v3574_v60, %s2890_s8 }
 0x2ea   : > { %v3767_v37 = vadd.f32 %v1111_v61, %v1095_v33 }
 0x2eb   : > { %v1149_v13 = vpop.permute.xlu1 %1148  ;;  %v1566_v39 = vpop.permute.xlu0 %1565 }
 0x2ec   : > { %1288 = vst.msk [vmem:[%s3681_s15 + $0x28] sm:$0xff] %vm1282_vm0, %v3767_v37  ;;  %2249 = vst.msk [vmem:[%s3432_s5 + $0xa0] sm:$0xff] %vm1282_vm0, %v1566_v39  ;;  %1377 = vrot.lane.b32.xlu1 %v1125_v19, %s2892_s30  ;;  %v3789_v19 = vld [vmem:[%s3297_s22 + $0x38] sm:$0xff]  ;;  %v1206_v39 = vmul.f32 %v950_v51, %v3467_v32  ;;  %v1207_v32 = vmul.f32 %v3747_v15, %v3480_v38 }
 0x2ed   : > { %1194 = vrot.lane.b32.xlu0 %v3574_v60, %s2891_s17  ;;  %v1065_v22 = vmul.f32 %v3789_v19, %v3507_v43 }
 0x2ef   : > { %v1181_v48 = vpop.permute.xlu1 %1180  ;;  %v1572_v49 = vpop.permute.xlu0 %1571 }
 0x2f0   : > { %2252 = vst.msk [vmem:[%s3432_s5 + $0xb8] sm:$0xff] %vm1282_vm0, %v1572_v49  ;;  %1458 = vrot.lane.b32.xlu1 %v3777_v29, %s2892_s30 }
 0x2f1   : > { %1022 = vrot.lane.b32.xlu0 %v3587_v4, %s2890_s8 }
 0x2f3   : > { %v1009_v2 = vpop.permute.xlu1 %1008  ;;  %v1570_v1 = vpop.permute.xlu0 %1569 }
 0x2f4   : > { %2251 = vst.msk [vmem:[%s3432_s5 + $0xb0] sm:$0xff] %vm1282_vm0, %v1570_v1  ;;  %v1081_v44 = vmul.f32 %v1009_v2, %v3786_v41 }
 0x2f5   : > { %1054 = vrot.lane.b32.xlu0 %v3587_v4, %s2891_s17 }
 0x2f6   : > { %v1097_v62 = vadd.f32 %v1081_v44, %v1065_v22  ;;  %v987_v22 = vld [vmem:[%s3668_s16 + $0x48] sm:$0xff] }
 0x2f7   : > { %v1041_v54 = vpop.permute.xlu1 %1040  ;;  %v1003_v14 = vpop.permute.xlu0 %1002 }
 0x2f8   : > { %v1078_v10 = vmul.f32 %v1003_v14, %v966_v46  ;;  %v1113_v35 = vmul.f32 %v1041_v54, %v3798_v17  ;;  %v1067_v54 = vmul.f32 %v3543_v52, %v3545_v53  ;;  %v1255_v52 = vmul.f32 %v1181_v48, %v3753_v21 }
 0x2f9   : > { %1166 = vrot.lane.b32.xlu0 %v3592_v6, %s2890_s8 }
 0x2fa   : > { %v3808_v24 = vadd.f32 %v1113_v35, %v1097_v62  ;;  %v1094_v28 = vadd.f32 %v1078_v10, %v1062_v18  ;;  %v1223_v62 = vmul.f32 %v1149_v13, %v3743_v3 }
 0x2fb   : > { %v3810_v25 = vpop.permute.xlu1 %1152  ;;  %v1035_v43 = vpop.permute.xlu0 %1034 }
 0x2fc   : > { %v1110_v0 = vmul.f32 %v1035_v43, %v982_v36  ;;  %1290 = vst.msk [vmem:[%s3681_s15 + $0x38] sm:$0xff] %vm1282_vm0, %v3808_v24  ;;  %v1239_v3 = vadd.f32 %v1223_v62, %v1207_v32 }
 0x2fd   : > { %1198 = vrot.lane.b32.xlu0 %v3592_v6, %s2891_s17 }
 0x2fe   : > { %v1126_v33 = vadd.f32 %v1110_v0, %v1094_v28  ;;  %v3846_v38 = vadd.f32 %v1255_v52, %v1239_v3  ;;  %v3854_v28 = vld [vmem:[%s3659_s18 + $0x58] sm:$0xff] }
 0x2ff   : > { %v3817_v61 = vpop.permute.xlu1 %1184  ;;  %v1147_v34 = vpop.permute.xlu0 %1146 }
 0x300   : > { %1287 = vst.msk [vmem:[%s3681_s15 + $0x20] sm:$0xff] %vm1282_vm0, %v1126_v33  ;;  %v1222_v31 = vmul.f32 %v1147_v34, %v966_v46  ;;  %1379 = vrot.lane.b32.xlu1 %v1126_v33, %s2892_s30 }
 0x302   : > { %v1238_v2 = vadd.f32 %v1222_v31, %v1206_v39  ;;  %v968_v31 = vld [vmem:[%s3659_s18 + $0x30] sm:$0xff] }
 0x303   : > { %v1013_v27 = vpop.permute.xlu1 %1012  ;;  %v1179_v49 = vpop.permute.xlu0 %1178 }
 0x304   : > { %v1083_v1 = vmul.f32 %v1013_v27, %v971_v16  ;;  %v1254_v44 = vmul.f32 %v1179_v49, %v982_v36  ;;  %v952_v27 = vld [vmem:[%s3297_s22 + $0x30] sm:$0xff] }
 0x305   : > { %v1208_v3 = vmul.f32 %v952_v27, %v3497_v42 }
 0x306   : > { %v3827_v14 = vadd.f32 %v1254_v44, %v1238_v2  ;;  %v1099_v35 = vadd.f32 %v1083_v1, %v1067_v54  ;;  %v984_v54 = vld [vmem:[%s3668_s16 + $0x30] sm:$0xff] }
 0x307   : > { %v1045_v46 = vpop.permute.xlu1 %1044  ;;  %v1576_v10 = vpop.permute.xlu0 %1575 }
 0x308   : > { %v1115_v18 = vmul.f32 %v1045_v46, %v987_v22  ;;  %2254 = vst.msk [vmem:[%s3432_s5 + $0xc8] sm:$0xff] %vm1282_vm0, %v1576_v10  ;;  %1460 = vrot.lane.b32.xlu1 %v3827_v14, %s2892_s30  ;;  %v1064_v46 = vmul.f32 %v952_v27, %v3490_v40  ;;  %v975_v40 = vld [vmem:[%s3659_s18 + $0x68] sm:$0xff]  ;;  %v1209_v27 = vmul.f32 %v3789_v19, %v3514_v45 }
 0x30a   : > { %v3837_v53 = vadd.f32 %v1115_v18, %v1099_v35 }
 0x30b   : > { %v1157_v51 = vpop.permute.xlu1 %1156  ;;  %v1574_v36 = vpop.permute.xlu0 %1573 }
 0x30c   : > { %1292 = vst.msk [vmem:[%s3681_s15 + $0x48] sm:$0xff] %vm1282_vm0, %v3837_v53  ;;  %v1227_v13 = vmul.f32 %v1157_v51, %v971_v16  ;;  %2253 = vst.msk [vmem:[%s3432_s5 + $0xc0] sm:$0xff] %vm1282_vm0, %v1574_v36  ;;  %1381 = vrot.lane.b32.xlu1 %v3767_v37, %s2892_s30  ;;  %v3859_v37 = vld [vmem:[%s3297_s22 + $0x58] sm:$0xff] }
 0x30d   : > { %v3866_v16 = vld [vmem:[%s3668_s16 + $0x58] sm:$0xff]  ;;  %v1069_v39 = vmul.f32 %v3859_v37, %v3562_v57 }
 0x30e   : > { %v1243_v15 = vadd.f32 %v1227_v13, %v3552_v55 }
 0x30f   : > { %v1189_v21 = vpop.permute.xlu1 %1188  ;;  %v1580_v48 = vpop.permute.xlu0 %1579 }
 0x310   : > { %v1259_v43 = vmul.f32 %v1189_v21, %v987_v22  ;;  %2256 = vst.msk [vmem:[%s3432_s5 + $0xd8] sm:$0xff] %vm1282_vm0, %v1580_v48  ;;  %1462 = vrot.lane.b32.xlu1 %v3846_v38, %s2892_s30 }
 0x312   : > { %v3856_v0 = vadd.f32 %v1259_v43, %v1243_v15 }
 0x313   : > { %v1017_v33 = vpop.permute.xlu1 %1016  ;;  %v1578_v34 = vpop.permute.xlu0 %1577 }
 0x314   : > { %v1085_v55 = vmul.f32 %v1017_v33, %v3854_v28  ;;  %2255 = vst.msk [vmem:[%s3432_s5 + $0xd0] sm:$0xff] %vm1282_vm0, %v1578_v34  ;;  %v991_v33 = vld [vmem:[%s3668_s16 + $0x68] sm:$0xff]  ;;  %v1071_v34 = vmul.f32 %v3577_v9, %v3579_v63  ;;  %v1257_v9 = vmul.f32 %v3817_v61, %v3798_v17 }
 0x316   : > { %v1101_v1 = vadd.f32 %v1085_v55, %v1069_v39 }
 0x317   : > { %v1049_v49 = vpop.permute.xlu1 %1048  ;;  %v1007_v2 = vpop.permute.xlu0 %1006 }
 0x318   : > { %v1080_v44 = vmul.f32 %v1007_v2, %v968_v31  ;;  %v1117_v22 = vmul.f32 %v1049_v49, %v3866_v16  ;;  %v1225_v49 = vmul.f32 %v3810_v25, %v3786_v41 }
 0x31a   : > { %v3874_v10 = vadd.f32 %v1117_v22, %v1101_v1  ;;  %v1096_v18 = vadd.f32 %v1080_v44, %v1064_v46  ;;  %v1241_v25 = vadd.f32 %v1225_v49, %v1209_v27  ;;  %v970_v46 = vld [vmem:[%s3659_s18 + $0x40] sm:$0xff] }
 0x31b   : > { %v3876_v62 = vpop.permute.xlu1 %1160  ;;  %v1039_v35 = vpop.permute.xlu0 %1038 }
 0x31c   : > { %v1112_v57 = vmul.f32 %v1039_v35, %v984_v54  ;;  %1294 = vst.msk [vmem:[%s3681_s15 + $0x58] sm:$0xff] %vm1282_vm0, %v3874_v10  ;;  %v3912_v45 = vadd.f32 %v1257_v9, %v1241_v25  ;;  %v972_v25 = vld [vmem:[%s3659_s18 + $0x50] sm:$0xff] }
 0x31e   : > { %v1128_v32 = vadd.f32 %v1112_v57, %v1096_v18  ;;  %v954_v18 = vld [vmem:[%s3297_s22 + $0x40] sm:$0xff] }
 0x31f   : > { %v3881_v52 = vpop.permute.xlu1 %1192  ;;  %v1151_v51 = vpop.permute.xlu0 %1150 }
 0x320   : > { %1289 = vst.msk [vmem:[%s3681_s15 + $0x30] sm:$0xff] %vm1282_vm0, %v1128_v32  ;;  %v1224_v36 = vmul.f32 %v1151_v51, %v968_v31  ;;  %1383 = vrot.lane.b32.xlu1 %v1128_v32, %s2892_s30 }
 0x322   : > { %v1240_v21 = vadd.f32 %v1224_v36, %v1208_v3  ;;  %v986_v36 = vld [vmem:[%s3668_s16 + $0x40] sm:$0xff]  ;;  %v1073_v3 = vmul.f32 %v3595_v23, %v3597_v7  ;;  %v1210_v7 = vmul.f32 %v954_v18, %v3532_v5 }
 0x323   : > { %v1021_v13 = vpop.permute.xlu1 %1020  ;;  %v1183_v15 = vpop.permute.xlu0 %1182 }
 0x324   : > { %v1087_v48 = vmul.f32 %v1021_v13, %v975_v40  ;;  %v1256_v43 = vmul.f32 %v1183_v15, %v984_v54  ;;  %v977_v54 = vld [vmem:[%s3659_s18 + $0x78] sm:$0xff] }
 0x326   : > { %v3891_v55 = vadd.f32 %v1256_v43, %v1240_v21  ;;  %v1103_v2 = vadd.f32 %v1087_v48, %v1071_v34 }
 0x327   : > { %v1053_v31 = vpop.permute.xlu1 %1052  ;;  %v1584_v39 = vpop.permute.xlu0 %1583 }
 0x328   : > { %v1119_v42 = vmul.f32 %v1053_v31, %v991_v33  ;;  %2258 = vst.msk [vmem:[%s3432_s5 + $0xe8] sm:$0xff] %vm1282_vm0, %v1584_v39  ;;  %1464 = vrot.lane.b32.xlu1 %v3891_v55, %s2892_s30 }
 0x32a   : > { %v3903_v63 = vadd.f32 %v1119_v42, %v1103_v2 }
 0x32b   : > { %v1165_v1 = vpop.permute.xlu1 %1164  ;;  %v1582_v41 = vpop.permute.xlu0 %1581 }
 0x32c   : > { %1296 = vst.msk [vmem:[%s3681_s15 + $0x68] sm:$0xff] %vm1282_vm0, %v3903_v63  ;;  %v1231_v44 = vmul.f32 %v1165_v1, %v975_v40  ;;  %2257 = vst.msk [vmem:[%s3432_s5 + $0xe0] sm:$0xff] %vm1282_vm0, %v1582_v41  ;;  %1385 = vrot.lane.b32.xlu1 %v3808_v24, %s2892_s30  ;;  %v1066_v40 = vmul.f32 %v954_v18, %v3524_v47 }
 0x32e   : > { %v1247_v19 = vadd.f32 %v1231_v44, %v3585_v12  ;;  %v993_v12 = vld [vmem:[%s3668_s16 + $0x78] sm:$0xff] }
 0x32f   : > { %v1197_v17 = vpop.permute.xlu1 %1196  ;;  %v1586_v61 = vpop.permute.xlu0 %1585 }
 0x330   : > { %v1263_v22 = vmul.f32 %v1197_v17, %v991_v33  ;;  %2259 = vst.msk [vmem:[%s3432_s5 + $0xf0] sm:$0xff] %vm1282_vm0, %v1586_v61  ;;  %1466 = vrot.lane.b32.xlu1 %v3912_v45, %s2892_s30  ;;  %v956_v17 = vld [vmem:[%s3297_s22 + $0x50] sm:$0xff] }
 0x332   : > { %v3921_v35 = vadd.f32 %v1263_v22, %v1247_v19 }
 0x333   : > { %v1025_v24 = vpop.permute.xlu1 %1024  ;;  %v1011_v57 = vpop.permute.xlu0 %1010 }
 0x334   : > { %v1089_v32 = vmul.f32 %v1025_v24, %v977_v54  ;;  %v1082_v51 = vmul.f32 %v1011_v57, %v970_v46 }
 0x336   : > { %v1105_v21 = vadd.f32 %v1089_v32, %v1073_v3  ;;  %v1098_v48 = vadd.f32 %v1082_v51, %v1066_v40 }
 0x337   : > { %v1057_v13 = vpop.permute.xlu1 %1056  ;;  %v1043_v15 = vpop.permute.xlu0 %1042 }
 0x338   : > { %v1121_v43 = vmul.f32 %v1057_v13, %v993_v12  ;;  %v1114_v33 = vmul.f32 %v1043_v15, %v986_v36 }
 0x33a   : > { %v3929_v34 = vadd.f32 %v1121_v43, %v1105_v21  ;;  %v1130_v31 = vadd.f32 %v1114_v33, %v1098_v48  ;;  %v974_v21 = vld [vmem:[%s3659_s18 + $0x60] sm:$0xff]  ;;  %v1213_v48 = vmul.f32 %v3859_v37, %v3567_v58  ;;  %v1261_v43 = vmul.f32 %v3881_v52, %v3866_v16 }
 0x33b   : > { %v1169_v39 = vpop.permute.xlu1 %1168  ;;  %v1155_v49 = vpop.permute.xlu0 %1154  ;;  %v990_v58 = vld [vmem:[%s3668_s16 + $0x60] sm:$0xff] }
 0x33c   : > { %1298 = vst.msk [vmem:[%s3681_s15 + $0x78] sm:$0xff] %vm1282_vm0, %v3929_v34  ;;  %1291 = vst.msk [vmem:[%s3681_s15 + $0x40] sm:$0xff] %vm1282_vm0, %v1130_v31  ;;  %v1233_v47 = vmul.f32 %v1169_v39, %v977_v54  ;;  %v1226_v23 = vmul.f32 %v1155_v49, %v970_v46  ;;  %1387 = vrot.lane.b32.xlu1 %v1130_v31, %s2892_s30  ;;  %v1068_v54 = vmul.f32 %v956_v17, %v3554_v8 }
 0x33d   : > { %v1212_v8 = vmul.f32 %v956_v17, %v3560_v56  ;;  %v958_v56 = vld [vmem:[%s3297_s22 + $0x60] sm:$0xff]  ;;  %v960_v17 = vld [vmem:[%s3297_s22 + $0x70] sm:$0xff] }
 0x33e   : > { %v1249_v2 = vadd.f32 %v1233_v47, %v3607_v11  ;;  %v1242_v9 = vadd.f32 %v1226_v23, %v1210_v7  ;;  %v988_v11 = vld [vmem:[%s3668_s16 + $0x50] sm:$0xff]  ;;  %v1070_v37 = vmul.f32 %v958_v56, %v3569_v59  ;;  %v1214_v59 = vmul.f32 %v958_v56, %v3574_v60 }
 0x33f   : > { %v1201_v42 = vpop.permute.xlu1 %1200  ;;  %v1187_v27 = vpop.permute.xlu0 %1186 }
 0x340   : > { %v1265_v1 = vmul.f32 %v1201_v42, %v993_v12  ;;  %v1258_v41 = vmul.f32 %v1187_v27, %v986_v36 }
 0x342   : > { %v3940_v44 = vadd.f32 %v1265_v1, %v1249_v2  ;;  %v3942_v19 = vadd.f32 %v1258_v41, %v1242_v9  ;;  %v976_v41 = vld [vmem:[%s3659_s18 + $0x70] sm:$0xff] }
 0x343   : > { %v1372_v61 = vpop.permute.xlu1 %1371  ;;  %v1015_v22 = vpop.permute.xlu0 %1014 }
 0x344   : > { %2221 = vst.msk [vmem:[%s3681_s15 + $0x80] sm:$0xff] %vm1282_vm0, %v1372_v61  ;;  %v1084_v5 = vmul.f32 %v1015_v22, %v972_v25  ;;  %1468 = vrot.lane.b32.xlu1 %v3942_v19, %s2892_s30 }
 0x346   : > { %v1100_v24 = vadd.f32 %v1084_v5, %v1068_v54  ;;  %v992_v5 = vld [vmem:[%s3668_s16 + $0x70] sm:$0xff] }
 0x347   : > { %v3951_v46 = vpop.permute.xlu1 %1452  ;;  %v1047_v18 = vpop.permute.xlu0 %1046 }
 0x348   : > { %v1116_v57 = vmul.f32 %v1047_v18, %v988_v11  ;;  %1389 = vrot.lane.b32.xlu1 %v3837_v53, %s2892_s30  ;;  %v1229_v53 = vmul.f32 %v3876_v62, %v3854_v28 }
 0x34a   : > { %v1132_v32 = vadd.f32 %v1116_v57, %v1100_v24  ;;  %v1245_v49 = vadd.f32 %v1229_v53, %v1213_v48 }
 0x34b   : > { %v1374_v51 = vpop.permute.xlu1 %1373  ;;  %v1159_v12 = vpop.permute.xlu0 %1158 }
 0x34c   : > { %1293 = vst.msk [vmem:[%s3681_s15 + $0x50] sm:$0xff] %vm1282_vm0, %v1132_v32  ;;  %2222 = vst.msk [vmem:[%s3681_s15 + $0x88] sm:$0xff] %vm1282_vm0, %v1374_v51  ;;  %v1228_v36 = vmul.f32 %v1159_v12, %v972_v25  ;;  %1470 = vrot.lane.b32.xlu1 %v3856_v0, %s2892_s30  ;;  %v3983_v16 = vadd.f32 %v1261_v43, %v1245_v49  ;;  %v1216_v51 = vmul.f32 %v960_v17, %v3592_v6 }
 0x34e   : > { %v1244_v13 = vadd.f32 %v1228_v36, %v1212_v8 }
 0x34f   : > { %v3962_v40 = vpop.permute.xlu1 %1454  ;;  %v1191_v3 = vpop.permute.xlu0 %1190 }
 0x350   : > { %v1260_v15 = vmul.f32 %v1191_v3, %v988_v11  ;;  %1391 = vrot.lane.b32.xlu1 %v1132_v32, %s2892_s30  ;;  %v1072_v11 = vmul.f32 %v960_v17, %v3587_v4  ;;  %v1744_v17 = vld [vmem:[%s3681_s15 + $0x30] sm:$0xff] (%p4369_p11) }
 0x351   : > { %1745 = vst [vmem:[%s4095_s6 + $0x30] sm:$0xff] (%p4369_p11), %v1744_v17 }
 0x352   : > { %v3972_v33 = vadd.f32 %v1260_v15, %v1244_v13 }
 0x353   : > { %v1376_v31 = vpop.permute.xlu1 %1375  ;;  %v1019_v39 = vpop.permute.xlu0 %1018 }
 0x354   : > { %2223 = vst.msk [vmem:[%s3681_s15 + $0x90] sm:$0xff] %vm1282_vm0, %v1376_v31  ;;  %v1086_v28 = vmul.f32 %v1019_v39, %v974_v21  ;;  %1393 = vrot.lane.b32.xlu1 %v3874_v10, %s2892_s30  ;;  %1472 = vrot.lane.b32.xlu0 %v3972_v33, %s2892_s30 }
 0x356   : > { %v1102_v52 = vadd.f32 %v1086_v28, %v1070_v37 }
 0x357   : > { %v1051_v62 = vpop.permute.xlu0 %1050 }
 0x358   : > { %v1118_v47 = vmul.f32 %v1051_v62, %v990_v58  ;;  %1474 = vrot.lane.b32.xlu1 %v3983_v16, %s2892_s30 }
 0x35a   : > { %v1134_v23 = vadd.f32 %v1118_v47, %v1102_v52  ;;  %v3987_v7 = vpop.permute.xlu1 %1456 }
 0x35b   : > { %v1163_v10 = vpop.permute.xlu0 %1162 }
 0x35c   : > { %1295 = vst.msk [vmem:[%s3681_s15 + $0x60] sm:$0xff] %vm1282_vm0, %v1134_v23  ;;  %v1230_v2 = vmul.f32 %v1163_v10, %v974_v21  ;;  %1395 = vrot.lane.b32.xlu1 %v1134_v23, %s2892_s30 }
 0x35e   : > { %v1378_v42 = vpop.permute.xlu1 %1377  ;;  %v1246_v9 = vadd.f32 %v1230_v2, %v1214_v59 }
 0x35f   : > { %2224 = vst.msk [vmem:[%s3681_s15 + $0x98] sm:$0xff] %vm1282_vm0, %v1378_v42  ;;  %v1195_v27 = vpop.permute.xlu0 %1194  ;;  %v1732_v42 = vld [vmem:[%s3681_s15] sm:$0xff] (%p4369_p11) }
 0x360   : > { %v1262_v1 = vmul.f32 %v1195_v27, %v990_v58  ;;  %v1734_v27 = vld [vmem:[%s3681_s15 + $0x8] sm:$0xff] (%p4369_p11)  ;;  %1733 = vst [vmem:[%s4095_s6] sm:$0xff] (%p4369_p11), %v1732_v42 }
 0x361   : > { %1735 = vst [vmem:[%s4095_s6 + $0x8] sm:$0xff] (%p4369_p11), %v1734_v27 }
 0x362   : > { %v1278_v25 = vadd.f32 %v1262_v1, %v1246_v9  ;;  %v1459_v12 = vpop.permute.xlu1 %1458  ;;  %v1736_v9 = vld [vmem:[%s3681_s15 + $0x10] sm:$0xff] (%p4369_p11)  ;;  %v1738_v1 = vld [vmem:[%s3681_s15 + $0x18] sm:$0xff] (%p4369_p11) }
 0x363   : > { %v1023_v61 = vpop.permute.xlu0 %1022  ;;  %1737 = vst [vmem:[%s4095_s6 + $0x10] sm:$0xff] (%p4369_p11), %v1736_v9  ;;  %1739 = vst [vmem:[%s4095_s6 + $0x18] sm:$0xff] (%p4369_p11), %v1738_v1 }
 0x364   : > { %v1088_v22 = vmul.f32 %v1023_v61, %v976_v41  ;;  %1476 = vrot.lane.b32.xlu1 %v1278_v25, %s2892_s30  ;;  %v1746_v61 = vld [vmem:[%s3681_s15 + $0x38] sm:$0xff] (%p4369_p11) }
 0x365   : > { %1747 = vst [vmem:[%s4095_s6 + $0x38] sm:$0xff] (%p4369_p11), %v1746_v61 }
 0x366   : > { %v1104_v18 = vadd.f32 %v1088_v22, %v1072_v11  ;;  %v1748_v22 = vld [vmem:[%s3681_s15 + $0x40] sm:$0xff] (%p4369_p11)  ;;  %v1752_v11 = vld [vmem:[%s3681_s15 + $0x50] sm:$0xff] (%p4369_p11) }
 0x367   : > { %v1055_v54 = vpop.permute.xlu0 %1054  ;;  %1749 = vst [vmem:[%s4095_s6 + $0x40] sm:$0xff] (%p4369_p11), %v1748_v22  ;;  %1753 = vst [vmem:[%s4095_s6 + $0x50] sm:$0xff] (%p4369_p11), %v1752_v11 }
 0x368   : > { %v1120_v60 = vmul.f32 %v1055_v54, %v992_v5  ;;  %1397 = vrot.lane.b32.xlu1 %v3903_v63, %s2892_s30  ;;  %v1754_v54 = vld [vmem:[%s3681_s15 + $0x58] sm:$0xff] (%p4369_p11) }
 0x369   : > { %1755 = vst [vmem:[%s4095_s6 + $0x58] sm:$0xff] (%p4369_p11), %v1754_v54 }
 0x36a   : > { %v1136_v24 = vadd.f32 %v1120_v60, %v1104_v18  ;;  %v1756_v18 = vld [vmem:[%s3681_s15 + $0x60] sm:$0xff] (%p4369_p11)  ;;  %v1758_v60 = vld [vmem:[%s3681_s15 + $0x68] sm:$0xff] (%p4369_p11) }
 0x36b   : > { %v1167_v57 = vpop.permute.xlu0 %1166  ;;  %1757 = vst [vmem:[%s4095_s6 + $0x60] sm:$0xff] (%p4369_p11), %v1756_v18  ;;  %1759 = vst [vmem:[%s4095_s6 + $0x68] sm:$0xff] (%p4369_p11), %v1758_v60 }
 0x36c   : > { %1297 = vst.msk [vmem:[%s3681_s15 + $0x70] sm:$0xff] %vm1282_vm0, %v1136_v24  ;;  %v1232_v32 = vmul.f32 %v1167_v57, %v976_v41  ;;  %1478 = vrot.lane.b32.xlu1 %v3921_v35, %s2892_s30  ;;  %v1740_v41 = vld [vmem:[%s3681_s15 + $0x20] sm:$0xff] (%p4369_p11)  ;;  %v1762_v57 = vld [vmem:[%s3681_s15 + $0x78] sm:$0xff] (%p4369_p11) }
 0x36d   : > { %1741 = vst [vmem:[%s4095_s6 + $0x20] sm:$0xff] (%p4369_p11), %v1740_v41  ;;  %1763 = vst [vmem:[%s4095_s6 + $0x78] sm:$0xff] (%p4369_p11), %v1762_v57 }
 0x36e   : > { %v1248_v4 = vadd.f32 %v1232_v32, %v1216_v51  ;;  %v1764_v32 = vld [vmem:[%s3681_s15 + $0x80] sm:$0xff] (%p4369_p11)  ;;  %v1766_v51 = vld [vmem:[%s3681_s15 + $0x88] sm:$0xff] (%p4369_p11) }
 0x36f   : > { %v1199_v36 = vpop.permute.xlu0 %1198  ;;  %1765 = vst [vmem:[%s4095_s6 + $0x100] sm:$0xff] (%p4369_p11), %v1764_v32  ;;  %1767 = vst [vmem:[%s4095_s6 + $0x108] sm:$0xff] (%p4369_p11), %v1766_v51 }
 0x370   : > { %v1264_v8 = vmul.f32 %v1199_v36, %v992_v5  ;;  %1399 = vrot.lane.b32.xlu1 %v1136_v24, %s2892_s30  ;;  %v1750_v5 = vld [vmem:[%s3681_s15 + $0x48] sm:$0xff] (%p4369_p11)  ;;  %v1770_v36 = vld [vmem:[%s3681_s15 + $0x98] sm:$0xff] (%p4369_p11) }
 0x371   : > { %1751 = vst [vmem:[%s4095_s6 + $0x48] sm:$0xff] (%p4369_p11), %v1750_v5  ;;  %1771 = vst [vmem:[%s4095_s6 + $0x118] sm:$0xff] (%p4369_p11), %v1770_v36 }
 0x372   : > { %v1280_v3 = vadd.f32 %v1264_v8, %v1248_v4  ;;  %v1380_v53 = vpop.permute.xlu1 %1379  ;;  %1299 = vxpose.xlu0.b32.start [1/16] (narrow) %v3709_v20, 64 }
 0x373   : > { %2225 = vst.msk [vmem:[%s3681_s15 + $0xa0] sm:$0xff] %vm1282_vm0, %v1380_v53  ;;  %v1760_v24 = vld [vmem:[%s3681_s15 + $0x70] sm:$0xff] (%p4369_p11) }
 0x374   : > { %1480 = vrot.lane.b32.xlu1 %v1280_v3, %s2892_s30  ;;  %1761 = vst [vmem:[%s4095_s6 + $0x70] sm:$0xff] (%p4369_p11), %v1760_v24 }
 0x376   : > { %1300 = vxpose.xlu0.b32.cont [2/16] (narrow) %v3729_v26, 64 }
 0x378   : > { %1401 = vrot.lane.b32.xlu1 %v3929_v34, %s2892_s30 }
 0x37a   : > { %v1461_v6 = vpop.permute.xlu1 %1460  ;;  %1301 = vxpose.xlu0.b32.cont [3/16] (narrow) %v3757_v30, 64  ;;  %v1772_v4 = vld [vmem:[%s3681_s15 + $0xa0] sm:$0xff] (%p4369_p11) }
 0x37b   : > { %1773 = vst [vmem:[%s4095_s6 + $0x120] sm:$0xff] (%p4369_p11), %v1772_v4 }
 0x37c   : > { %1482 = vrot.lane.b32.xlu1 %v3940_v44, %s2892_s30 }
 0x37e   : > { %v1382_v63 = vpop.permute.xlu1 %1381  ;;  %1302 = vxpose.xlu0.b32.cont [4/16] (narrow) %v3777_v29, 64 }
 0x37f   : > { %2226 = vst.msk [vmem:[%s3681_s15 + $0xa8] sm:$0xff] %vm1282_vm0, %v1382_v63 }
 0x382   : > { %1303 = vxpose.xlu0.b32.cont [5/16] (narrow) %v3827_v14, 64  ;;  %v1463_v20 = vpop.permute.xlu1 %1462 }
 0x386   : > { %1304 = vxpose.xlu0.b32.cont [6/16] (narrow) %v3846_v38, 64  ;;  %v1774_v8 = vld [vmem:[%s3681_s15 + $0xa8] sm:$0xff] (%p4369_p11) }
 0x387   : > { %1775 = vst [vmem:[%s4095_s6 + $0x128] sm:$0xff] (%p4369_p11), %v1774_v8 }
 0x38a   : > { %1305 = vxpose.xlu0.b32.cont [7/16] (narrow) %v3891_v55, 64 }
 0x38e   : > { %1306 = vxpose.xlu0.b32.cont [8/16] (narrow) %v3912_v45, 64 }
 0x392   : > { %v1384_v26 = vpop.permute.xlu1 %1383  ;;  %1307 = vxpose.xlu0.b32.cont [9/16] (narrow) %v3942_v19, 64 }
 0x393   : > { %2227 = vst.msk [vmem:[%s3681_s15 + $0xb0] sm:$0xff] %vm1282_vm0, %v1384_v26 }
 0x396   : > { %1308 = vxpose.xlu0.b32.cont [10/16] (narrow) %v3856_v0, 64 }
 0x39a   : > { %v1465_v30 = vpop.permute.xlu1 %1464  ;;  %1309 = vxpose.xlu0.b32.cont [11/16] (narrow) %v3972_v33, 64 }
 0x39e   : > { %v1386_v29 = vpop.permute.xlu1 %1385  ;;  %1310 = vxpose.xlu0.b32.cont [12/16] (narrow) %v3983_v16, 64 }
 0x39f   : > { %2228 = vst.msk [vmem:[%s3681_s15 + $0xb8] sm:$0xff] %vm1282_vm0, %v1386_v29 }
 0x3a2   : > { %1311 = vxpose.xlu0.b32.cont [13/16] (narrow) %v1278_v25, 64  ;;  %v1467_v14 = vpop.permute.xlu1 %1466  ;;  %v1742_v25 = vld [vmem:[%s3681_s15 + $0x28] sm:$0xff] (%p4369_p11) }
 0x3a3   : > { %1743 = vst [vmem:[%s4095_s6 + $0x28] sm:$0xff] (%p4369_p11), %v1742_v25 }
 0x3a5   : > { %1500 = vxpose.xlu1.b32.start [1/16] (narrow) %v3951_v46, 64 }
 0x3a6   : > { %1312 = vxpose.xlu0.b32.cont [14/16] (narrow) %v3921_v35, 64  ;;  %v1778_v53 = vld [vmem:[%s3681_s15 + $0xb8] sm:$0xff] (%p4369_p11) }
 0x3a7   : > { %1779 = vst [vmem:[%s4095_s6 + $0x138] sm:$0xff] (%p4369_p11), %v1778_v53 }
 0x3a9   : > { %1501 = vxpose.xlu1.b32.cont [2/16] (narrow) %v3962_v40, 64 }
 0x3aa   : > { %1313 = vxpose.xlu0.b32.cont [15/16] (narrow) %v1280_v3, 64  ;;  %v1776_v3 = vld [vmem:[%s3681_s15 + $0xb0] sm:$0xff] (%p4369_p11) }
 0x3ab   : > { %1777 = vst [vmem:[%s4095_s6 + $0x130] sm:$0xff] (%p4369_p11), %v1776_v3 }
 0x3ad   : > { %1502 = vxpose.xlu1.b32.cont [3/16] (narrow) %v3987_v7, 64 }
 0x3ae   : > { %v1388_v38 = vpop.permute.xlu1 %1387  ;;  %1314 = vxpose.xlu0.b32.end [16/16] (narrow) %v3940_v44, 64 }
 0x3af   : > { %2229 = vst.msk [vmem:[%s3681_s15 + $0xc0] sm:$0xff] %vm1282_vm0, %v1388_v38 }
 0x3b1   : > { %1503 = vxpose.xlu1.b32.cont [4/16] (narrow) %v1459_v12, 64  ;;  %v1768_v12 = vld [vmem:[%s3681_s15 + $0x90] sm:$0xff] (%p4369_p11) }
 0x3b2   : > { %1769 = vst [vmem:[%s4095_s6 + $0x110] sm:$0xff] (%p4369_p11), %v1768_v12 }
 0x3b5   : > { %1504 = vxpose.xlu1.b32.cont [5/16] (narrow) %v1461_v6, 64 }
 0x3b6   : > { %v1469_v0 = vpop.permute.xlu1 %1468  ;;  %v1780_v6 = vld [vmem:[%s3681_s15 + $0xc0] sm:$0xff] (%p4369_p11) }
 0x3b7   : > { %1781 = vst [vmem:[%s4095_s6 + $0x140] sm:$0xff] (%p4369_p11), %v1780_v6 }
 0x3b9   : > { %1505 = vxpose.xlu1.b32.cont [6/16] (narrow) %v1463_v20, 64 }
 0x3ba   : > { %v1390_v55 = vpop.permute.xlu1 %1389 }
 0x3bb   : > { %2230 = vst.msk [vmem:[%s3681_s15 + $0xc8] sm:$0xff] %vm1282_vm0, %v1390_v55 }
 0x3bd   : > { %1506 = vxpose.xlu1.b32.cont [7/16] (narrow) %v1465_v30, 64 }
 0x3be   : > { %v1471_v45 = vpop.permute.xlu1 %1470 }
 0x3c1   : > { %1507 = vxpose.xlu1.b32.cont [8/16] (narrow) %v1467_v14, 64 }
 0x3c2   : > { %v1392_v35 = vpop.permute.xlu1 %1391  ;;  %v1782_v63 = vld [vmem:[%s3681_s15 + $0xc8] sm:$0xff] (%p4369_p11) }
 0x3c3   : > { %2231 = vst.msk [vmem:[%s3681_s15 + $0xd0] sm:$0xff] %vm1282_vm0, %v1392_v35  ;;  %1783 = vst [vmem:[%s4095_s6 + $0x148] sm:$0xff] (%p4369_p11), %v1782_v63 }
 0x3c5   : > { %1508 = vxpose.xlu1.b32.cont [9/16] (narrow) %v1469_v0, 64 }
 0x3c6   : > { %v1394_v34 = vpop.permute.xlu1 %1393  ;;  %v1473_v19 = vpop.permute.xlu0 %1472 }
 0x3c7   : > { %2232 = vst.msk [vmem:[%s3681_s15 + $0xd8] sm:$0xff] %vm1282_vm0, %v1394_v34 }
 0x3c9   : > { %1509 = vxpose.xlu1.b32.cont [10/16] (narrow) %v1471_v45, 64 }
 0x3ca   : > { %v1475_v44 = vpop.permute.xlu1 %1474  ;;  %v1784_v20 = vld [vmem:[%s3681_s15 + $0xd0] sm:$0xff] (%p4369_p11) }
 0x3cb   : > { %1785 = vst [vmem:[%s4095_s6 + $0x150] sm:$0xff] (%p4369_p11), %v1784_v20 }
 0x3cd   : > { %1510 = vxpose.xlu1.b32.cont [11/16] (narrow) %v1473_v19, 64 }
 0x3ce   : > { %v1396_v46 = vpop.permute.xlu1 %1395  ;;  %v1786_v26 = vld [vmem:[%s3681_s15 + $0xd8] sm:$0xff] (%p4369_p11) }
 0x3cf   : > { %2233 = vst.msk [vmem:[%s3681_s15 + $0xe0] sm:$0xff] %vm1282_vm0, %v1396_v46  ;;  %1787 = vst [vmem:[%s4095_s6 + $0x158] sm:$0xff] (%p4369_p11), %v1786_v26 }
 0x3d1   : > { %1511 = vxpose.xlu1.b32.cont [12/16] (narrow) %v1475_v44, 64 }
 0x3d6   : > { %v1477_v40 = vpop.permute.xlu1 %1476  ;;  %v1788_v30 = vld [vmem:[%s3681_s15 + $0xe0] sm:$0xff] (%p4369_p11) }
 0x3d7   : > { %1587 = vrot.lane.b32.xlu0 %v3526_v50, %s2892_s30  ;;  %1512 = vxpose.xlu1.b32.cont [13/16] (narrow) %v1477_v40, 64  ;;  %1789 = vst [vmem:[%s4095_s6 + $0x160] sm:$0xff] (%p4369_p11), %v1788_v30 }
 0x3da   : > { %v1398_v13 = vpop.permute.xlu1 %1397 }
 0x3db   : > { %2234 = vst.msk [vmem:[%s3681_s15 + $0xe8] sm:$0xff] %vm1282_vm0, %v1398_v13 }
 0x3de   : > { %v1479_v15 = vpop.permute.xlu1 %1478 }
 0x3df   : > { %1513 = vxpose.xlu1.b32.cont [14/16] (narrow) %v1479_v15, 64 }
 0x3e2   : > { %v1400_v21 = vpop.permute.xlu1 %1399  ;;  %v1790_v29 = vld [vmem:[%s3681_s15 + $0xe8] sm:$0xff] (%p4369_p11) }
 0x3e3   : > { %2235 = vst.msk [vmem:[%s3681_s15 + $0xf0] sm:$0xff] %vm1282_vm0, %v1400_v21  ;;  %1791 = vst [vmem:[%s4095_s6 + $0x168] sm:$0xff] (%p4369_p11), %v1790_v29 }
 0x3e6   : > { %v1481_v48 = vpop.permute.xlu1 %1480 }
 0x3e7   : > { %1514 = vxpose.xlu1.b32.cont [15/16] (narrow) %v1481_v48, 64 }
 0x3ea   : > { %v1402_v43 = vpop.permute.xlu1 %1401  ;;  %v1792_v14 = vld [vmem:[%s3681_s15 + $0xf0] sm:$0xff] (%p4369_p11) }
 0x3eb   : > { %2236 = vst.msk [vmem:[%s3681_s15 + $0xf8] sm:$0xff] %vm1282_vm0, %v1402_v43  ;;  %1793 = vst [vmem:[%s4095_s6 + $0x170] sm:$0xff] (%p4369_p11), %v1792_v14 }
 0x3ee   : > { %v1483_v33 = vpop.permute.xlu1 %1482 }
 0x3ef   : > { %1515 = vxpose.xlu1.b32.end [16/16] (narrow) %v1483_v33, 64 }
 0x3f2   : > { %v1315_v56 = vpop.trf.xlu0  ;;  %v1794_v38 = vld [vmem:[%s3681_s15 + $0xf8] sm:$0xff] (%p4369_p11) }
 0x3f3   : > { %1331 = vst [vmem:[%s4058_s14] sm:$0xff] %v1315_v56  ;;  %1795 = vst [vmem:[%s4095_s6 + $0x178] sm:$0xff] (%p4369_p11), %v1794_v38 }
 0x3f6   : > { %v1316_v50 = vpop.trf.xlu0 }
 0x3f7   : > { %1332 = vst [vmem:[%s4058_s14 + $0x8] sm:$0xff] %v1316_v50 }
 0x3fa   : > { %v1317_v31 = vpop.trf.xlu0 }
 0x3fb   : > { %1333 = vst [vmem:[%s4058_s14 + $0x10] sm:$0xff] %v1317_v31 }
 0x3fe   : > { %v1318_v39 = vpop.trf.xlu0 }
 0x3ff   : > { %1334 = vst [vmem:[%s4058_s14 + $0x18] sm:$0xff] %v1318_v39 }
 0x402   : > { %v1319_v49 = vpop.trf.xlu0 }
 0x403   : > { %1335 = vst [vmem:[%s4058_s14 + $0x20] sm:$0xff] %v1319_v49 }
 0x406   : > { %v1320_v28 = vpop.trf.xlu0 }
 0x407   : > { %1336 = vst [vmem:[%s4058_s14 + $0x28] sm:$0xff] %v1320_v28 }
 0x40a   : > { %v1321_v58 = vpop.trf.xlu0 }
 0x40b   : > { %1337 = vst [vmem:[%s4058_s14 + $0x30] sm:$0xff] %v1321_v58 }
 0x40e   : > { %v1322_v37 = vpop.trf.xlu0 }
 0x40f   : > { %1338 = vst [vmem:[%s4058_s14 + $0x38] sm:$0xff] %v1322_v37 }
 0x433   : > { %v1516_v16 = vpop.trf.xlu1 }
 0x434   : > { %2237 = vst [vmem:[%s4058_s14 + $0x40] sm:$0xff] %v1516_v16 }
 0x437   : > { %v1517_v62 = vpop.trf.xlu1 }
 0x438   : > { %2238 = vst [vmem:[%s4058_s14 + $0x48] sm:$0xff] %v1517_v62 }
 0x43b   : > { %v1518_v52 = vpop.trf.xlu1 }
 0x43c   : > { %2239 = vst [vmem:[%s4058_s14 + $0x50] sm:$0xff] %v1518_v52 }
 0x43f   : > { %v1519_v47 = vpop.trf.xlu1 }
 0x440   : > { %2240 = vst [vmem:[%s4058_s14 + $0x58] sm:$0xff] %v1519_v47 }
 0x443   : > { %v1520_v23 = vpop.trf.xlu1 }
 0x444   : > { %2241 = vst [vmem:[%s4058_s14 + $0x60] sm:$0xff] %v1520_v23 }
 0x447   : > { %v1521_v7 = vpop.trf.xlu1 }
 0x448   : > { %2242 = vst [vmem:[%s4058_s14 + $0x68] sm:$0xff] %v1521_v7 }
 0x449   : > { %v1588_v10 = vpop.permute.xlu0 %1587 }
 0x44a   : > { %2260 = vst.msk [vmem:[%s3432_s5 + $0xf8] sm:$0xff] %vm1282_vm0, %v1588_v10  ;;  %1637 = sbr.rel (!%p4369_p11) target bundleno = 1105 (0x451), region = 64 }
 0x44b   : > { %v1522_v2 = vpop.trf.xlu1 }
 0x44c   : > { %2243 = vst [vmem:[%s4058_s14 + $0x70] sm:$0xff] %v1522_v2 }
 0x44f   : > { %v1523_v59 = vpop.trf.xlu1 }
 0x450   : > { %2244 = vst [vmem:[%s4058_s14 + $0x78] sm:$0xff] %v1523_v59 }
 0x451 PF: > { %s4373_s22 = sld [smem:[#allocation19_spill]]  ;;  %s4374_s1 = sld [smem:[#allocation18_spill]] }
 0x452   : > { %s1809_s17 = sshll.u32 %s4058_s14, 4  ;;  %s4375_s29 = sld [smem:[#allocation32_spill]]  ;;  %s4155_s17 = int_to_ptr.vmem [resolvable:$true] %s1809_s17 }
 0x453   : > { %s2748_s9 = scalar_lea.vmem %s4155_s17, 2048  ;;  %p4377_p3 = scmp.ne.s32.totalorder %s4353_s21, 0 }
 0x454   : > { %p2749_p8 = scmp.ne.s32.totalorder %s4155_s17, %s2748_s9  ;;  %s2893_s10 = smov [#allocation11]  }
 0x455   : > { %s2752_s23 = sshll.u32 %s2893_s10, 4  ;;  %s2753_s23 = int_to_ptr.vmem [resolvable:$false] %s2752_s23 }
 0x456   : > { %p2750_p1 = pnand %p2749_p8, %p4377_p3  ;;  %s2754_s14 = scalar_lea.vmem %s2753_s23, 4096 }
 0x457   : > { %s2267_s8 = sshll.u32 %s4373_s22, 5  ;;  %p2755_p2 = scmp.lt.s32.totalorder %s4155_s17, %s2753_s23 }
 0x458   : > { %s1806_s30 = sadd.s32 %s4374_s1, %s2267_s8  ;;  %s4376_s20 = smov %s4375_s29 }
 0x459   : > { %s2268_s18 = sshll.u32 %s1806_s30, 7  ;;  %p2751_p6 = pneg %p2750_p1 }
 0x45a   : > { %s4160_s15 = scalar_lea.hbm %s4375_s29, %s2268_s18  ;;  %p2756_p4 = scmp.lt.s32.totalorder %s2754_s14, %s2748_s9 }
 0x45c   : > { %p2757_p12 = por %p2756_p4, %p2755_p2 }
 0x45e   : > { %p2758_p10 = pnand %p2757_p12, %p2751_p6 }
 0x460   : > { %2761 = shalt.err (!%p2758_p10)
}
 0x461   : > { %s2762_s4 = scalar_lea.hbm %s4160_s15, 2048  ;;  %s2766_s6 = scalar_lea.hbm %s4376_s20, 8192 }
 0x462   : > { %p2763_p13 = scmp.ne.s32.totalorder %s4160_s15, %s2762_s4  ;;  %p2767_p0 = scmp.lt.u32.totalorder %s4160_s15, %s4376_s20 }
 0x463   : > { %p2768_p5 = scmp.lt.u32.totalorder %s2766_s6, %s2762_s4  ;;  %p2770_p8 = scmp.lt.u32.totalorder %s2762_s4, %s4160_s15 }
 0x464   : > { %p2764_p9 = pnand %p2763_p13, %p4377_p3 }
 0x465   : > { %p2769_p11 = por %p2768_p5, %p2767_p0 }
 0x466   : > { %p2765_p7 = pneg %p2764_p9 }
 0x467   : > { %p2771_p1 = por %p2770_p8, %p2769_p11 }
 0x469   : > { %p2772_p6 = pnand %p2771_p1, %p2765_p7 }
 0x46b   : > { %2775 = shalt.err (!%p2772_p6)
}
 0x46c   : > { %s2894_s8 = smov 128   ;;  %s2895_s30 = smov 256   ;;  %v1913_v0 = vld [vmem:[%s3432_s5] sm:$0xff] (%p4377_p3)  ;;  %v1915_v55 = vld [vmem:[%s3432_s5 + $0x8] sm:$0xff] (%p4377_p3)  ;;  %v1917_v45 = vld [vmem:[%s3432_s5 + $0x10] sm:$0xff] (%p4377_p3) }
 0x46d   : > { %s2896_s18 = smov 8   ;;  %1818 = sbr.rel (!%p4377_p3) target bundleno = 1161 (0x489), region = 106  ;;  %v1919_v35 = vld [vmem:[%s3432_s5 + $0x18] sm:$0xff] (%p4377_p3)  ;;  %v1921_v34 = vld [vmem:[%s3432_s5 + $0x20] sm:$0xff] (%p4377_p3)  ;;  %v1923_v44 = vld [vmem:[%s3432_s5 + $0x28] sm:$0xff] (%p4377_p3) }
 0x46e   : > { %2441 = dma.vmem_to_hbm [thread:$0]  (%p4377_p3), %s4155_s17, 2048, %s4160_s15, %s1627_s19, %s2894_s8, %s2895_s30, %s2896_s18  }
 0x46f   : > { %s4378_s16 = sld [smem:[#allocation18_spill]] (%p4377_p3)  ;;  %s4379_s0 = sld [smem:[#allocation19_spill]] (%p4377_p3)  ;;  %v1925_v19 = vld [vmem:[%s3432_s5 + $0x30] sm:$0xff] (%p4377_p3)  ;;  %v1927_v46 = vld [vmem:[%s3432_s5 + $0x38] sm:$0xff] (%p4377_p3)  ;;  %v1929_v40 = vld [vmem:[%s3432_s5 + $0x40] sm:$0xff] (%p4377_p3) }
 0x470   : > { %s4380_s9 = sld [smem:[#allocation33_spill]] (%p4377_p3)  ;;  %v1931_v13 = vld [vmem:[%s3432_s5 + $0x48] sm:$0xff] (%p4377_p3)  ;;  %v1933_v15 = vld [vmem:[%s3432_s5 + $0x50] sm:$0xff] (%p4377_p3)  ;;  %v1935_v21 = vld [vmem:[%s3432_s5 + $0x58] sm:$0xff] (%p4377_p3) }
 0x471   : > { %v1937_v48 = vld [vmem:[%s3432_s5 + $0x60] sm:$0xff] (%p4377_p3)  ;;  %v1939_v43 = vld [vmem:[%s3432_s5 + $0x68] sm:$0xff] (%p4377_p3)  ;;  %v1941_v33 = vld [vmem:[%s3432_s5 + $0x70] sm:$0xff] (%p4377_p3) }
 0x472   : > { %v1943_v56 = vld [vmem:[%s3432_s5 + $0x78] sm:$0xff] (%p4377_p3)  ;;  %v1945_v50 = vld [vmem:[%s3432_s5 + $0x80] sm:$0xff] (%p4377_p3)  ;;  %v1947_v31 = vld [vmem:[%s3432_s5 + $0x88] sm:$0xff] (%p4377_p3) }
 0x473   : > { %v1949_v39 = vld [vmem:[%s3432_s5 + $0x90] sm:$0xff] (%p4377_p3)  ;;  %v1951_v49 = vld [vmem:[%s3432_s5 + $0x98] sm:$0xff] (%p4377_p3)  ;;  %v1953_v28 = vld [vmem:[%s3432_s5 + $0xa0] sm:$0xff] (%p4377_p3) }
 0x474   : > { %v1955_v58 = vld [vmem:[%s3432_s5 + $0xa8] sm:$0xff]  ;;  %v1957_v37 = vld [vmem:[%s3432_s5 + $0xb0] sm:$0xff]  ;;  %v1959_v16 = vld [vmem:[%s3432_s5 + $0xb8] sm:$0xff] }
 0x475   : > { %s2269_s29 = sshll.u32 %s4378_s16, 4  ;;  %s2270_s13 = sshll.u32 %s4379_s0, 6  ;;  %v1961_v62 = vld [vmem:[%s3432_s5 + $0xc0] sm:$0xff]  ;;  %v1963_v52 = vld [vmem:[%s3432_s5 + $0xc8] sm:$0xff]  ;;  %v1965_v47 = vld [vmem:[%s3432_s5 + $0xd0] sm:$0xff] }
 0x476   : > { %s1821_s21 = sadd.s32 %s2270_s13, %s2269_s29  ;;  %v1967_v23 = vld [vmem:[%s3432_s5 + $0xd8] sm:$0xff]  ;;  %v1969_v7 = vld [vmem:[%s3432_s5 + $0xe0] sm:$0xff]  ;;  %v1971_v10 = vld [vmem:[%s3432_s5 + $0xe8] sm:$0xff] }
 0x477   : > { %s2271_s19 = sshll.u32 %s1821_s21, 3  ;;  %v1973_v2 = vld [vmem:[%s3432_s5 + $0xf0] sm:$0xff]  ;;  %v1975_v59 = vld [vmem:[%s3432_s5 + $0xf8] sm:$0xff] }
 0x478   : > { %s4201_s10 = scalar_lea.vmem %s4380_s9, %s2271_s19 }
 0x479   : > { %1914 = vst [vmem:[%s4201_s10] sm:$0xff] %v1913_v0  ;;  %1916 = vst [vmem:[%s4201_s10 + $0x8] sm:$0xff] %v1915_v55 }
 0x47a   : > { %1918 = vst [vmem:[%s4201_s10 + $0x10] sm:$0xff] %v1917_v45  ;;  %1920 = vst [vmem:[%s4201_s10 + $0x18] sm:$0xff] %v1919_v35 }
 0x47b   : > { %1922 = vst [vmem:[%s4201_s10 + $0x20] sm:$0xff] %v1921_v34  ;;  %1924 = vst [vmem:[%s4201_s10 + $0x28] sm:$0xff] %v1923_v44 }
 0x47c   : > { %1926 = vst [vmem:[%s4201_s10 + $0x30] sm:$0xff] %v1925_v19  ;;  %1928 = vst [vmem:[%s4201_s10 + $0x38] sm:$0xff] %v1927_v46 }
 0x47d   : > { %1930 = vst [vmem:[%s4201_s10 + $0x40] sm:$0xff] %v1929_v40  ;;  %1932 = vst [vmem:[%s4201_s10 + $0x48] sm:$0xff] %v1931_v13 }
 0x47e   : > { %1934 = vst [vmem:[%s4201_s10 + $0x50] sm:$0xff] %v1933_v15  ;;  %1936 = vst [vmem:[%s4201_s10 + $0x58] sm:$0xff] %v1935_v21 }
 0x47f   : > { %1938 = vst [vmem:[%s4201_s10 + $0x60] sm:$0xff] %v1937_v48  ;;  %1940 = vst [vmem:[%s4201_s10 + $0x68] sm:$0xff] %v1939_v43 }
 0x480   : > { %1942 = vst [vmem:[%s4201_s10 + $0x70] sm:$0xff] %v1941_v33  ;;  %1944 = vst [vmem:[%s4201_s10 + $0x78] sm:$0xff] %v1943_v56 }
 0x481   : > { %1946 = vst [vmem:[%s4201_s10 + $0x100] sm:$0xff] %v1945_v50  ;;  %1948 = vst [vmem:[%s4201_s10 + $0x108] sm:$0xff] %v1947_v31 }
 0x482   : > { %1950 = vst [vmem:[%s4201_s10 + $0x110] sm:$0xff] %v1949_v39  ;;  %1952 = vst [vmem:[%s4201_s10 + $0x118] sm:$0xff] %v1951_v49 }
 0x483   : > { %1954 = vst [vmem:[%s4201_s10 + $0x120] sm:$0xff] %v1953_v28  ;;  %1956 = vst [vmem:[%s4201_s10 + $0x128] sm:$0xff] %v1955_v58 }
 0x484   : > { %1958 = vst [vmem:[%s4201_s10 + $0x130] sm:$0xff] %v1957_v37  ;;  %1960 = vst [vmem:[%s4201_s10 + $0x138] sm:$0xff] %v1959_v16 }
 0x485   : > { %1962 = vst [vmem:[%s4201_s10 + $0x140] sm:$0xff] %v1961_v62  ;;  %1964 = vst [vmem:[%s4201_s10 + $0x148] sm:$0xff] %v1963_v52 }
 0x486   : > { %1966 = vst [vmem:[%s4201_s10 + $0x150] sm:$0xff] %v1965_v47  ;;  %1968 = vst [vmem:[%s4201_s10 + $0x158] sm:$0xff] %v1967_v23 }
 0x487   : > { %1970 = vst [vmem:[%s4201_s10 + $0x160] sm:$0xff] %v1969_v7  ;;  %1972 = vst [vmem:[%s4201_s10 + $0x168] sm:$0xff] %v1971_v10 }
 0x488   : > { %1974 = vst [vmem:[%s4201_s10 + $0x170] sm:$0xff] %v1973_v2  ;;  %1976 = vst [vmem:[%s4201_s10 + $0x178] sm:$0xff] %v1975_v59 }
 0x489 PF: > { %p2467_p3 = scmp.ge.s32.totalorder %s2878_s11, 2  ;;  %s1995_s23 = sand.u32 1, %s2850_s27  }
 0x48a   : > { %p4381_p2 = scmp.ne.s32.totalorder %s4354_s24, 0  ;;  %s1996_s14 = scalar_lea.sflag [#allocation4], %s1995_s23 }
 0x48c   : > { %p2461_p4 = pnand %p2467_p3, %p4381_p2 }
 0x48e   : > { %2833 = dma.done.wait (!%p2461_p4), %s1996_s14, 2048  }
 0x48f   : > { %2835 = vsyncadd (!%p2461_p4), %s1996_s14, 4294965248  ;;  %s25_s11 = sadd.s32 1, %s2878_s11   ;;  %s4382_s5 = sld [smem:[#allocation25_spill]] }
 0x490   : > { %p22_p12 = scmp.ge.s32.totalorder %s25_s11, 6   ;;  %s4383_s4 = sld [smem:[#allocation17_spill]] }
 0x491   : > { %s4384_s29 = sld [smem:[#allocation24_spill]]  ;;  %s4385_s30 = sld [smem:[#allocation20_spill]] }
 0x492   : > { %s4386_s8 = sld [smem:[#allocation21_spill]]  ;;  %s4387_s9 = sld [smem:[#allocation22_spill]] }
 0x493   : > { %s4388_s10 = sld [smem:[#allocation23_spill]]  ;;  %s4389_s24 = smov %s2842_s25 }
 0x494   : > { %s4390_s25 = smov %s2846_s26  ;;  %s4392_s27 = smov %s2854_s28 }
 0x495   : > { %s4391_s26 = smov %s4382_s5  ;;  %24 = sbr.rel (!%p22_p12) target bundleno = 19 (0x13), region = 225 }
 0x496   : > { %s4393_s28 = smov %s4383_s4 }
 0x49c   :  { %2008 = vsyncpa [#allocation3], 1 }
 0x49d   :  { %2010 = vsyncpa [#allocation3 + $0x1], 1 }
 0x49e   :  { %2011 = vsyncpa [#allocation6], 1 }
 0x49f   :  { %2012 = vsyncpa [#allocation4], 1 }
 0x4a0   :  { %2014 = vsyncpa [#allocation4 + $0x1], 1 }

</bundles_post_ra>
